<compile_context>
chip_gen: v7x
topology: tpu7x:2x2x1
jax: 0.10.0
libtpu: 0.0.40
codegen_flags: <defaults>
</compile_context>

<pallas_src>
import functools

import jax
import jax.numpy as jnp
from jax.experimental import pallas as pl
from jax.experimental.pallas import tpu as pltpu


def _round_up(x, m):
    return ((x + m - 1) // m) * m


def _ln_padded(x, gamma, beta, n_valid, eps=1e-5):
    """LayerNorm over the first n_valid lanes of a zero-padded [T, D_pad] tile.

    Padded lanes of x are exactly zero and gamma/beta are zero-padded, so
    sum(x)/sum(x*x) over ALL lanes equal the valid-lane sums, and padded
    output lanes are (0-mu)*rsqrt(var)*0 + 0 == 0 exactly.
    Two independent reductions (shorter XLU chain than mu -> d -> sum(d*d)).
    """
    inv_n = 1.0 / float(n_valid)
    s1 = jnp.sum(x, axis=-1, keepdims=True)
    s2 = jnp.sum(x * x, axis=-1, keepdims=True)
    mu = s1 * inv_n
    var = jnp.maximum(s2 * inv_n - mu * mu, 0.0)
    return (x - mu) * jax.lax.rsqrt(var + eps) * gamma + beta


def r_actor_kernel(
    # per-tile activations
    obs_ref, h_ref, mask_ref, avail_ref,
    # resident weights: matmul matrices (maybe bf16) + one f32 vector slab
    w1_ref, w2_ref, wi_ref, wh_ref, wact_ref, vec_ref,
    # outputs (1 ref if action/logp packed into h_out padding lanes, else 2)
    *out_refs,
    obs_dim, hidden, obs_pad, h_pad, a_pad, pack_in_h,
):
    f32 = jnp.float32
    mm_dtype = w1_ref.dtype          # bf16 on v5e/v6e/v7x MXU, or f32 (exact path)

    # consolidated 1-row vectors (static lane-aligned slices of one VMEM slab)
    vec = vec_ref[...]
    fn_g, fn_b = vec[0:1, :obs_pad], vec[1:2, :obs_pad]
    b1, g1, be1 = vec[2:3, :h_pad], vec[3:4, :h_pad], vec[4:5, :h_pad]
    b2, g2, be2 = vec[5:6, :h_pad], vec[6:7, :h_pad], vec[7:8, :h_pad]
    bi_all = vec[8:9, :3 * h_pad]
    bh_all = vec[9:10, :3 * h_pad]
    g_rnn, b_rnn = vec[10:11, :h_pad], vec[11:12, :h_pad]
    b_act = vec[12:13, :a_pad]

    def mm(a, w_ref):
        # bf16 operands (MXU-native), f32 accumulation; everything else stays f32
        return jnp.dot(a.astype(mm_dtype), w_ref[...], preferred_element_type=f32)

    # ---- MLPBase: feature_norm -> (Linear+ReLU+LayerNorm) x2 ----
    x = _ln_padded(obs_ref[...], fn_g, fn_b, obs_dim)
    x = _ln_padded(jnp.maximum(mm(x, w1_ref) + b1, 0.0), g1, be1, hidden)
    x = _ln_padded(jnp.maximum(mm(x, w2_ref) + b2, 0.0), g2, be2, hidden)

    # ---- RNNLayer: masked hidden + one GRU step (recurrent_N = 1) ----
    # Two lane-aligned matmuls (no concat): gates live at cols [g*H_P, g*H_P+H)
    h = h_ref[...] * mask_ref[...]                              # [T,Hp] * [T,1]
    gi = mm(x, wi_ref) + bi_all                                 # [T, 3*Hp]
    gh = mm(h, wh_ref) + bh_all                                 # [T, 3*Hp]
    r = jax.nn.sigmoid(gi[:, :h_pad] + gh[:, :h_pad])
    z = jax.nn.sigmoid(gi[:, h_pad:2 * h_pad] + gh[:, h_pad:2 * h_pad])
    n = jnp.tanh(gi[:, 2 * h_pad:] + r * gh[:, 2 * h_pad:])
    h_new = (1.0 - z) * n + z * h                               # padded lanes stay 0
    feat = _ln_padded(h_new, g_rnn, b_rnn, hidden)              # RNNLayer.norm

    # ---- ACTLayer (Discrete, deterministic=True -> mode) ----
    logits = mm(feat, wact_ref) + b_act
    # padded action lanes have avail == 0, masked off with unavailable actions
    logits = jnp.where(avail_ref[...] == 0.0, jnp.float32(-1e10), logits)
    m = jnp.max(logits, axis=-1, keepdims=True)
    e = jnp.exp(logits - m)
    s = jnp.sum(e, axis=-1, keepdims=True)
    logp_all = (logits - m) - jnp.log(s)                        # log_softmax

    idx = jax.lax.broadcasted_iota(jnp.int32, logits.shape, 1)
    # first-occurrence argmax (matches jnp.argmax; torch tie-break unspecified)
    action = jnp.min(jnp.where(logits == m, idx, a_pad), axis=-1, keepdims=True)
    logp = jnp.sum(jnp.where(idx == action, logp_all, 0.0), axis=-1, keepdims=True)

    if pack_in_h:
        # single lane-dense output: h_new plus action/logp packed into the two
        # highest (otherwise-zero) padding lanes -> no separate 512B/row slab.
        (hout_ref,) = out_refs
        col = jax.lax.broadcasted_iota(jnp.int32, hout_ref.shape, 1)
        hout_ref[...] = (h_new
                         + jnp.where(col == h_pad - 2, action.astype(f32), 0.0)
                         + jnp.where(col == h_pad - 1, logp, 0.0))
    else:
        # fallback when hidden is an exact multiple of 128 (no free lanes)
        slab_ref, hout_ref = out_refs
        hout_ref[...] = h_new
        scol = jax.lax.broadcasted_iota(jnp.int32, slab_ref.shape, 1)
        slab_ref[...] = (jnp.where(scol == 0, action.astype(f32), 0.0)
                         + jnp.where(scol == 1, logp, 0.0))


def prepare_params(params, weight_dtype=jnp.bfloat16):
    """One-time parameter prep (hoisted out of the forward path):
    transpose to [in, out], zero-pad feature dims to multiples of 128 lanes,
    repack GRU gates per-gate at lane-aligned offsets, cast matmul weights to
    `weight_dtype` (bf16 by default; f32 accumulation is kept in-kernel), and
    stack all 1-row bias/gamma/beta vectors into one f32 VMEM slab."""
    f32 = jnp.float32
    hidden, obs_dim = params["w1"].shape
    action_dim = params["w_act"].shape[0]
    assert action_dim < (1 << 24), "action index is round-tripped through f32"
    H = hidden
    OBS_P = _round_up(obs_dim, 128)
    H_P = _round_up(hidden, 128)
    A_P = _round_up(action_dim, 128)
    MAXW = max(OBS_P, 3 * H_P, A_P)

    def padm(a, rows, cols):
        out = jnp.zeros((rows, cols), f32)
        out = out.at[: a.shape[0], : a.shape[1]].set(a.astype(f32))
        return out.astype(weight_dtype)

    def gate_pack(w):
        # [3H, H] torch GRU weight -> [H_P, 3*H_P], gate g at cols [g*H_P, g*H_P+H)
        out = jnp.zeros((H_P, 3 * H_P), f32)
        for g in range(3):
            out = out.at[:H, g * H_P:g * H_P + H].set(w[g * H:(g + 1) * H].T.astype(f32))
        return out.astype(weight_dtype)

    def gate_bias(b):
        out = jnp.zeros((MAXW,), f32)
        for g in range(3):
            out = out.at[g * H_P:g * H_P + H].set(b[g * H:(g + 1) * H].astype(f32))
        return out

    def vec_row(v):
        out = jnp.zeros((MAXW,), f32)
        return out.at[: v.shape[0]].set(v.astype(f32))

    rows = [
        vec_row(params["fn_g"]), vec_row(params["fn_b"]),
        vec_row(params["b1"]), vec_row(params["g1"]), vec_row(params["be1"]),
        vec_row(params["b2"]), vec_row(params["g2"]), vec_row(params["be2"]),
        gate_bias(params["b_ih"]), gate_bias(params["b_hh"]),
        vec_row(params["g_rnn"]), vec_row(params["b_rnn"]),
        vec_row(params["b_act"]),
    ]
    n_rows = _round_up(len(rows), 8)
    vec = jnp.zeros((n_rows, MAXW), f32).at[: len(rows)].set(jnp.stack(rows))

    return dict(
        w1=padm(params["w1"].T, OBS_P, H_P),
        w2=padm(params["w2"].T, H_P, H_P),
        w_i=gate_pack(params["w_ih"]),
        w_h=gate_pack(params["w_hh"]),
        w_act=padm(params["w_act"].T, H_P, A_P),
        vec=vec,
    )


def r_actor_forward(obs, rnn_states, masks, available_actions, prep, *,
                    tile_b=512, core_parallel=False):
    """obs [B,obs_dim], rnn_states [B,1,H], masks [B,1], available_actions [B,A],
    prep = prepare_params(params).  Returns (actions [B,1] i32, logp [B,1] f32,
    rnn_states [B,1,H] f32).  core_parallel=True splits the batch grid axis
    across v7x's 2 TensorCores (leave False on v5e/v6e)."""
    f32 = jnp.float32
    B, obs_dim = obs.shape
    hidden = rnn_states.shape[-1]
    OBS_P, H_P = prep["w1"].shape
    A_P = prep["w_act"].shape[1]
    pack_in_h = (H_P - hidden) >= 2      # free padding lanes for action/logp

    # large default tile (grid-step overhead amortization); scales down for small B
    TILE_B = min(tile_b, _round_up(B, 8))
    B_pad = _round_up(B, TILE_B)

    def pad2(a, rows, cols):
        return jnp.pad(a.astype(f32), ((0, rows - a.shape[0]), (0, cols - a.shape[1])))

    obs_p = pad2(obs, B_pad, OBS_P)
    h_p = pad2(rnn_states[:, 0, :], B_pad, H_P)
    mask_p = pad2(masks, B_pad, 1)
    avail_p = pad2(available_actions, B_pad, A_P)

    btile = lambda d: pl.BlockSpec((TILE_B, d), lambda i: (i, 0))
    # constant index_map -> weights stay VMEM-resident across the batch grid
    # TODO(synk): try pipeline_mode=pl.Buffered(1) on these resident specs to
    # drop the second (unused) buffer once that path is known-safe.
    wspec = lambda a: pl.BlockSpec(a.shape, lambda i: (0, 0))

    weights = (prep["w1"], prep["w2"], prep["w_i"], prep["w_h"],
               prep["w_act"], prep["vec"])
    in_specs = ([btile(OBS_P), btile(H_P),
                 pl.BlockSpec((TILE_B, 1), lambda i: (i, 0)),
                 btile(A_P)]
                + [wspec(w) for w in weights])

    if pack_in_h:
        out_shape = (jax.ShapeDtypeStruct((B_pad, H_P), f32),)
        out_specs = (btile(H_P),)
    else:
        out_shape = (jax.ShapeDtypeStruct((B_pad, 128), f32),
                     jax.ShapeDtypeStruct((B_pad, H_P), f32))
        out_specs = (pl.BlockSpec((TILE_B, 128), lambda i: (i, 0)), btile(H_P))

    # advisory cost estimate so XLA schedules the surrounding ops sensibly
    wbytes = sum(int(w.size) * int(w.dtype.itemsize) for w in weights)
    flops = 2 * B_pad * (OBS_P * H_P + H_P * H_P + 2 * H_P * 3 * H_P + H_P * A_P)
    transcend = B_pad * (3 * H_P + A_P)
    bytes_acc = wbytes + 4 * B_pad * (OBS_P + H_P + 1 + A_P + H_P
                                      + (0 if pack_in_h else 128))

    kernel = functools.partial(
        r_actor_kernel, obs_dim=obs_dim, hidden=hidden,
        obs_pad=OBS_P, h_pad=H_P, a_pad=A_P, pack_in_h=pack_in_h)

    dim_sem = (pltpu.CORE_PARALLEL,) if core_parallel else ("parallel",)

    outs = pl.pallas_call(
        kernel,
        grid=(B_pad // TILE_B,),
        out_shape=out_shape,
        in_specs=in_specs,
        out_specs=out_specs,
        compiler_params=pltpu.CompilerParams(
            dimension_semantics=dim_sem,
            # explicit limit: large TILE_B must not trip v5e's 16 MiB default
            # scoped VMEM; 48 MiB fits physical VMEM on v5e/v6e/v7x.
            vmem_limit_bytes=48 * 1024 * 1024),
        cost_estimate=pl.CostEstimate(flops=flops, transcendentals=transcend,
                                      bytes_accessed=bytes_acc),
    )(obs_p, h_p, mask_p, avail_p, *weights)

    if pack_in_h:
        (h_out,) = outs
        actions = h_out[:B, H_P - 2:H_P - 1].astype(jnp.int32)
        logp = h_out[:B, H_P - 1:H_P]
    else:
        slab, h_out = outs
        actions = slab[:B, 0:1].astype(jnp.int32)
        logp = slab[:B, 1:2]
    rnn_out = h_out[:B, :hidden].reshape(B, 1, hidden)
    return actions, logp, rnn_out


def init_params(key, obs_dim, hidden, action_dim):
    ks = jax.random.split(key, 8)
    u = lambda k, shape, s=0.1: (jax.random.uniform(k, shape, jnp.float32) - 0.5) * 2 * s
    return dict(
        fn_g=jnp.ones((obs_dim,), jnp.float32), fn_b=jnp.zeros((obs_dim,), jnp.float32),
        w1=u(ks[0], (hidden, obs_dim)), b1=jnp.zeros((hidden,), jnp.float32),
        g1=jnp.ones((hidden,), jnp.float32), be1=jnp.zeros((hidden,), jnp.float32),
        w2=u(ks[1], (hidden, hidden)), b2=jnp.zeros((hidden,), jnp.float32),
        g2=jnp.ones((hidden,), jnp.float32), be2=jnp.zeros((hidden,), jnp.float32),
        w_ih=u(ks[2], (3 * hidden, hidden)), w_hh=u(ks[3], (3 * hidden, hidden)),
        b_ih=u(ks[4], (3 * hidden,)), b_hh=u(ks[5], (3 * hidden,)),
        g_rnn=jnp.ones((hidden,), jnp.float32), b_rnn=jnp.zeros((hidden,), jnp.float32),
        w_act=u(ks[6], (action_dim, hidden), 0.01),
        b_act=jnp.zeros((action_dim,), jnp.float32),
    )


def _layer_norm(x, gamma, beta, eps=1e-5):
    mu = jnp.mean(x, axis=-1, keepdims=True)
    var = jnp.mean((x - mu) ** 2, axis=-1, keepdims=True)
    return (x - mu) * jax.lax.rsqrt(var + eps) * gamma + beta


def reference_forward(obs, rnn_states, masks, avail, p, matmul_dtype=jnp.float32):
    """Pure-JAX reference mirroring the PyTorch modules (deterministic path).
    matmul_dtype=jnp.bfloat16 mirrors the kernel's bf16-operand matmuls so the
    golden check stays tight; jnp.float32 is the exact original semantics."""
    ln = _layer_norm
    md = matmul_dtype

    def mm(a, w):
        return jnp.dot(a.astype(md), w.astype(md).T, preferred_element_type=jnp.float32)

    x = ln(obs, p["fn_g"], p["fn_b"])
    x = ln(jnp.maximum(mm(x, p["w1"]) + p["b1"], 0.0), p["g1"], p["be1"])
    x = ln(jnp.maximum(mm(x, p["w2"]) + p["b2"], 0.0), p["g2"], p["be2"])
    h = rnn_states[:, 0, :] * masks
    H = h.shape[-1]
    gi = mm(x, p["w_ih"]) + p["b_ih"]
    gh = mm(h, p["w_hh"]) + p["b_hh"]
    r = jax.nn.sigmoid(gi[:, :H] + gh[:, :H])
    z = jax.nn.sigmoid(gi[:, H:2 * H] + gh[:, H:2 * H])
    n = jnp.tanh(gi[:, 2 * H:] + r * gh[:, 2 * H:])
    h_new = (1 - z) * n + z * h
    x = ln(h_new, p["g_rnn"], p["b_rnn"])
    logits = mm(x, p["w_act"]) + p["b_act"]
    logits = jnp.where(avail == 0.0, -1e10, logits)
    logp_all = jax.nn.log_softmax(logits, axis=-1)
    act = jnp.argmax(logits, axis=-1, keepdims=True)
    logp = jnp.take_along_axis(logp_all, act, axis=-1)
    return act.astype(jnp.int32), logp, h_new[:, None, :]


if __name__ == "__main__":
    OBS_DIM, HIDDEN, ACT_DIM, REC_N = 16, 32, 8, 1

    key = jax.random.PRNGKey(0)
    k_p, k_data = jax.random.split(key)
    params = init_params(k_p, OBS_DIM, HIDDEN, ACT_DIM)
    # one-time param prep (hoisted out of the call path): f32 exact + bf16 fast
    preps = {"f32": prepare_params(params, jnp.float32),
             "bf16": prepare_params(params, jnp.bfloat16)}
    jax.block_until_ready(preps)

    fwd = jax.jit(r_actor_forward, static_argnames=("tile_b", "core_parallel"))

    # case 1: single tile (B=8, large default tile); case 2: multi-tile grid
    # with batch padding (B=20, tile_b=8 -> 3 grid steps)
    for B, tile_b in ((8, 512), (20, 8)):
        k_obs, k_h, k_av, k_data = jax.random.split(k_data, 4)
        obs = jax.random.normal(k_obs, (B, OBS_DIM), jnp.float32)
        rnn_states = jax.random.normal(k_h, (B, REC_N, HIDDEN), jnp.float32)
        masks = jnp.ones((B, 1), jnp.float32).at[0, 0].set(0.0)
        avail = (jax.random.uniform(k_av, (B, ACT_DIM)) > 0.2).astype(jnp.float32)
        avail = avail.at[:, 0].set(1.0)      # guarantee >=1 available action

        for name, mdt in (("f32", jnp.float32), ("bf16", jnp.bfloat16)):
            actions, logp, new_states = fwd(obs, rnn_states, masks, avail,
                                            preps[name], tile_b=tile_b)
            jax.block_until_ready((actions, logp, new_states))

            ref_a, ref_lp, ref_h = reference_forward(obs, rnn_states, masks, avail,
                                                     params, matmul_dtype=mdt)
            assert actions.shape == (B, 1) and logp.shape == (B, 1)
            assert new_states.shape == (B, REC_N, HIDDEN)
            assert jnp.all(actions == ref_a)
            assert jnp.allclose(logp, ref_lp, atol=2e-4, rtol=2e-4)
            assert jnp.allclose(new_states, ref_h, atol=2e-4, rtol=2e-4)

    # TODO(synk): deterministic=False (Categorical sampling) and
    # evaluate_actions (entropy) paths are not implemented in-kernel; sampling
    # would need pltpu.prng_seed/prng_random_bits + Gumbel/inverse-CDF draw.
    print("KERNEL_OK")
</pallas_src>

<mosaic_0001>
module attributes {stable_mosaic.version = 11 : i64} {
  func.func @r_actor_kernel(%arg0: i32, %arg1: memref<8x128xf32, #tpu.memory_space<vmem>>, %arg2: memref<8x128xf32, #tpu.memory_space<vmem>>, %arg3: memref<8x1xf32, #tpu.memory_space<vmem>>, %arg4: memref<8x128xf32, #tpu.memory_space<vmem>>, %arg5: memref<128x128xf32, #tpu.memory_space<vmem>>, %arg6: memref<128x128xf32, #tpu.memory_space<vmem>>, %arg7: memref<128x384xf32, #tpu.memory_space<vmem>>, %arg8: memref<128x384xf32, #tpu.memory_space<vmem>>, %arg9: memref<128x128xf32, #tpu.memory_space<vmem>>, %arg10: memref<16x384xf32, #tpu.memory_space<vmem>>, %arg11: memref<8x128xf32, #tpu.memory_space<vmem>>) attributes {dimension_semantics = [#tpu.dimension_semantics<parallel>], iteration_bounds = array<i64: 1>, scalar_prefetch = 0 : i64, scratch_operands = 0 : i64, tpu.core_type = #tpu.core_type<tc>, window_params = [{transform_indices = @transform_0, window_bounds = array<i64: 8, 128>}, {transform_indices = @transform_1, window_bounds = array<i64: 8, 128>}, {transform_indices = @transform_2, window_bounds = array<i64: 8, 1>}, {transform_indices = @transform_3, window_bounds = array<i64: 8, 128>}, {pipeline_mode = #tpu.pipeline_mode<synchronous>, transform_indices = @transform_4, window_bounds = array<i64: 128, 128>}, {pipeline_mode = #tpu.pipeline_mode<synchronous>, transform_indices = @transform_5, window_bounds = array<i64: 128, 128>}, {pipeline_mode = #tpu.pipeline_mode<synchronous>, transform_indices = @transform_6, window_bounds = array<i64: 128, 384>}, {pipeline_mode = #tpu.pipeline_mode<synchronous>, transform_indices = @transform_7, window_bounds = array<i64: 128, 384>}, {pipeline_mode = #tpu.pipeline_mode<synchronous>, transform_indices = @transform_8, window_bounds = array<i64: 128, 128>}, {pipeline_mode = #tpu.pipeline_mode<synchronous>, transform_indices = @transform_9, window_bounds = array<i64: 16, 384>}, {transform_indices = @transform_10, window_bounds = array<i64: 8, 128>}]} {
    %c0 = arith.constant 0 : index
    %c0_0 = arith.constant 0 : index
    %0 = vector.load %arg10[%c0, %c0_0] : memref<16x384xf32, #tpu.memory_space<vmem>>, vector<16x384xf32>
    %1 = vector.extract_strided_slice %0 {offsets = [0, 0], sizes = [1, 128], strides = [1, 1]} : vector<16x384xf32> to vector<1x128xf32>
    %2 = vector.extract_strided_slice %0 {offsets = [1, 0], sizes = [1, 128], strides = [1, 1]} : vector<16x384xf32> to vector<1x128xf32>
    %3 = vector.extract_strided_slice %0 {offsets = [2, 0], sizes = [1, 128], strides = [1, 1]} : vector<16x384xf32> to vector<1x128xf32>
    %4 = vector.extract_strided_slice %0 {offsets = [3, 0], sizes = [1, 128], strides = [1, 1]} : vector<16x384xf32> to vector<1x128xf32>
    %5 = vector.extract_strided_slice %0 {offsets = [4, 0], sizes = [1, 128], strides = [1, 1]} : vector<16x384xf32> to vector<1x128xf32>
    %6 = vector.extract_strided_slice %0 {offsets = [5, 0], sizes = [1, 128], strides = [1, 1]} : vector<16x384xf32> to vector<1x128xf32>
    %7 = vector.extract_strided_slice %0 {offsets = [6, 0], sizes = [1, 128], strides = [1, 1]} : vector<16x384xf32> to vector<1x128xf32>
    %8 = vector.extract_strided_slice %0 {offsets = [7, 0], sizes = [1, 128], strides = [1, 1]} : vector<16x384xf32> to vector<1x128xf32>
    %9 = vector.extract_strided_slice %0 {offsets = [8, 0], sizes = [1, 384], strides = [1, 1]} : vector<16x384xf32> to vector<1x384xf32>
    %10 = vector.extract_strided_slice %0 {offsets = [9, 0], sizes = [1, 384], strides = [1, 1]} : vector<16x384xf32> to vector<1x384xf32>
    %11 = vector.extract_strided_slice %0 {offsets = [10, 0], sizes = [1, 128], strides = [1, 1]} : vector<16x384xf32> to vector<1x128xf32>
    %12 = vector.extract_strided_slice %0 {offsets = [11, 0], sizes = [1, 128], strides = [1, 1]} : vector<16x384xf32> to vector<1x128xf32>
    %13 = vector.extract_strided_slice %0 {offsets = [12, 0], sizes = [1, 128], strides = [1, 1]} : vector<16x384xf32> to vector<1x128xf32>
    %c0_1 = arith.constant 0 : index
    %c0_2 = arith.constant 0 : index
    %14 = vector.load %arg1[%c0_1, %c0_2] : memref<8x128xf32, #tpu.memory_space<vmem>>, vector<8x128xf32>
    %cst = arith.constant dense<0.000000e+00> : vector<8xf32>
    %15 = vector.multi_reduction <add>, %14, %cst [1] : vector<8x128xf32> to vector<8xf32>
    %16 = vector.shape_cast %15 : vector<8xf32> to vector<8x1xf32>
    %17 = arith.mulf %14, %14 : vector<8x128xf32>
    %cst_3 = arith.constant dense<0.000000e+00> : vector<8xf32>
    %18 = vector.multi_reduction <add>, %17, %cst_3 [1] : vector<8x128xf32> to vector<8xf32>
    %19 = vector.shape_cast %18 : vector<8xf32> to vector<8x1xf32>
    %cst_4 = arith.constant 6.250000e-02 : f32
    %20 = vector.broadcast %cst_4 : f32 to vector<8x1xf32>
    %21 = arith.mulf %16, %20 : vector<8x1xf32>
    %cst_5 = arith.constant 6.250000e-02 : f32
    %22 = vector.broadcast %cst_5 : f32 to vector<8x1xf32>
    %23 = arith.mulf %19, %22 : vector<8x1xf32>
    %24 = arith.mulf %21, %21 : vector<8x1xf32>
    %25 = arith.subf %23, %24 : vector<8x1xf32>
    %cst_6 = arith.constant 0.000000e+00 : f32
    %26 = vector.broadcast %cst_6 : f32 to vector<8x1xf32>
    %27 = arith.maximumf %25, %26 : vector<8x1xf32>
    %28 = vector.broadcast %21 : vector<8x1xf32> to vector<8x128xf32>
    %29 = arith.subf %14, %28 : vector<8x128xf32>
    %cst_7 = arith.constant 9.99999974E-6 : f32
    %30 = vector.broadcast %cst_7 : f32 to vector<8x1xf32>
    %31 = arith.addf %27, %30 : vector<8x1xf32>
    %32 = math.rsqrt %31 : vector<8x1xf32>
    %33 = vector.broadcast %32 : vector<8x1xf32> to vector<8x128xf32>
    %34 = arith.mulf %29, %33 : vector<8x128xf32>
    %35 = vector.broadcast %1 : vector<1x128xf32> to vector<8x128xf32>
    %36 = arith.mulf %34, %35 : vector<8x128xf32>
    %37 = vector.broadcast %2 : vector<1x128xf32> to vector<8x128xf32>
    %38 = arith.addf %36, %37 : vector<8x128xf32>
    %c0_8 = arith.constant 0 : index
    %c0_9 = arith.constant 0 : index
    %39 = vector.load %arg5[%c0_8, %c0_9] : memref<128x128xf32, #tpu.memory_space<vmem>>, vector<128x128xf32>
    %cst_10 = arith.constant dense<0.000000e+00> : vector<8x128xf32>
    %40 = tpu.matmul %38, %39, %cst_10 {dimension_numbers = #tpu.dot_dimension_numbers<[1], [0], [0], [1], [0, 0, 1, 1], [], []>} : vector<8x128xf32>, vector<128x128xf32>, vector<8x128xf32> -> vector<8x128xf32>
    %41 = vector.broadcast %3 : vector<1x128xf32> to vector<8x128xf32>
    %42 = arith.addf %40, %41 : vector<8x128xf32>
    %cst_11 = arith.constant 0.000000e+00 : f32
    %43 = vector.broadcast %cst_11 : f32 to vector<8x128xf32>
    %44 = arith.maximumf %42, %43 : vector<8x128xf32>
    %cst_12 = arith.constant dense<0.000000e+00> : vector<8xf32>
    %45 = vector.multi_reduction <add>, %44, %cst_12 [1] : vector<8x128xf32> to vector<8xf32>
    %46 = vector.shape_cast %45 : vector<8xf32> to vector<8x1xf32>
    %47 = arith.mulf %44, %44 : vector<8x128xf32>
    %cst_13 = arith.constant dense<0.000000e+00> : vector<8xf32>
    %48 = vector.multi_reduction <add>, %47, %cst_13 [1] : vector<8x128xf32> to vector<8xf32>
    %49 = vector.shape_cast %48 : vector<8xf32> to vector<8x1xf32>
    %cst_14 = arith.constant 3.125000e-02 : f32
    %50 = vector.broadcast %cst_14 : f32 to vector<8x1xf32>
    %51 = arith.mulf %46, %50 : vector<8x1xf32>
    %cst_15 = arith.constant 3.125000e-02 : f32
    %52 = vector.broadcast %cst_15 : f32 to vector<8x1xf32>
    %53 = arith.mulf %49, %52 : vector<8x1xf32>
    %54 = arith.mulf %51, %51 : vector<8x1xf32>
    %55 = arith.subf %53, %54 : vector<8x1xf32>
    %cst_16 = arith.constant 0.000000e+00 : f32
    %56 = vector.broadcast %cst_16 : f32 to vector<8x1xf32>
    %57 = arith.maximumf %55, %56 : vector<8x1xf32>
    %58 = vector.broadcast %51 : vector<8x1xf32> to vector<8x128xf32>
    %59 = arith.subf %44, %58 : vector<8x128xf32>
    %cst_17 = arith.constant 9.99999974E-6 : f32
    %60 = vector.broadcast %cst_17 : f32 to vector<8x1xf32>
    %61 = arith.addf %57, %60 : vector<8x1xf32>
    %62 = math.rsqrt %61 : vector<8x1xf32>
    %63 = vector.broadcast %62 : vector<8x1xf32> to vector<8x128xf32>
    %64 = arith.mulf %59, %63 : vector<8x128xf32>
    %65 = vector.broadcast %4 : vector<1x128xf32> to vector<8x128xf32>
    %66 = arith.mulf %64, %65 : vector<8x128xf32>
    %67 = vector.broadcast %5 : vector<1x128xf32> to vector<8x128xf32>
    %68 = arith.addf %66, %67 : vector<8x128xf32>
    %c0_18 = arith.constant 0 : index
    %c0_19 = arith.constant 0 : index
    %69 = vector.load %arg6[%c0_18, %c0_19] : memref<128x128xf32, #tpu.memory_space<vmem>>, vector<128x128xf32>
    %cst_20 = arith.constant dense<0.000000e+00> : vector<8x128xf32>
    %70 = tpu.matmul %68, %69, %cst_20 {dimension_numbers = #tpu.dot_dimension_numbers<[1], [0], [0], [1], [0, 0, 1, 1], [], []>} : vector<8x128xf32>, vector<128x128xf32>, vector<8x128xf32> -> vector<8x128xf32>
    %71 = vector.broadcast %6 : vector<1x128xf32> to vector<8x128xf32>
    %72 = arith.addf %70, %71 : vector<8x128xf32>
    %cst_21 = arith.constant 0.000000e+00 : f32
    %73 = vector.broadcast %cst_21 : f32 to vector<8x128xf32>
    %74 = arith.maximumf %72, %73 : vector<8x128xf32>
    %cst_22 = arith.constant dense<0.000000e+00> : vector<8xf32>
    %75 = vector.multi_reduction <add>, %74, %cst_22 [1] : vector<8x128xf32> to vector<8xf32>
    %76 = vector.shape_cast %75 : vector<8xf32> to vector<8x1xf32>
    %77 = arith.mulf %74, %74 : vector<8x128xf32>
    %cst_23 = arith.constant dense<0.000000e+00> : vector<8xf32>
    %78 = vector.multi_reduction <add>, %77, %cst_23 [1] : vector<8x128xf32> to vector<8xf32>
    %79 = vector.shape_cast %78 : vector<8xf32> to vector<8x1xf32>
    %cst_24 = arith.constant 3.125000e-02 : f32
    %80 = vector.broadcast %cst_24 : f32 to vector<8x1xf32>
    %81 = arith.mulf %76, %80 : vector<8x1xf32>
    %cst_25 = arith.constant 3.125000e-02 : f32
    %82 = vector.broadcast %cst_25 : f32 to vector<8x1xf32>
    %83 = arith.mulf %79, %82 : vector<8x1xf32>
    %84 = arith.mulf %81, %81 : vector<8x1xf32>
    %85 = arith.subf %83, %84 : vector<8x1xf32>
    %cst_26 = arith.constant 0.000000e+00 : f32
    %86 = vector.broadcast %cst_26 : f32 to vector<8x1xf32>
    %87 = arith.maximumf %85, %86 : vector<8x1xf32>
    %88 = vector.broadcast %81 : vector<8x1xf32> to vector<8x128xf32>
    %89 = arith.subf %74, %88 : vector<8x128xf32>
    %cst_27 = arith.constant 9.99999974E-6 : f32
    %90 = vector.broadcast %cst_27 : f32 to vector<8x1xf32>
    %91 = arith.addf %87, %90 : vector<8x1xf32>
    %92 = math.rsqrt %91 : vector<8x1xf32>
    %93 = vector.broadcast %92 : vector<8x1xf32> to vector<8x128xf32>
    %94 = arith.mulf %89, %93 : vector<8x128xf32>
    %95 = vector.broadcast %7 : vector<1x128xf32> to vector<8x128xf32>
    %96 = arith.mulf %94, %95 : vector<8x128xf32>
    %97 = vector.broadcast %8 : vector<1x128xf32> to vector<8x128xf32>
    %98 = arith.addf %96, %97 : vector<8x128xf32>
    %c0_28 = arith.constant 0 : index
    %c0_29 = arith.constant 0 : index
    %99 = vector.load %arg2[%c0_28, %c0_29] : memref<8x128xf32, #tpu.memory_space<vmem>>, vector<8x128xf32>
    %c0_30 = arith.constant 0 : index
    %c0_31 = arith.constant 0 : index
    %100 = vector.load %arg3[%c0_30, %c0_31] : memref<8x1xf32, #tpu.memory_space<vmem>>, vector<8x1xf32>
    %101 = vector.broadcast %100 : vector<8x1xf32> to vector<8x128xf32>
    %102 = arith.mulf %99, %101 : vector<8x128xf32>
    %c0_32 = arith.constant 0 : index
    %c0_33 = arith.constant 0 : index
    %103 = vector.load %arg7[%c0_32, %c0_33] : memref<128x384xf32, #tpu.memory_space<vmem>>, vector<128x384xf32>
    %cst_34 = arith.constant dense<0.000000e+00> : vector<8x384xf32>
    %104 = tpu.matmul %98, %103, %cst_34 {dimension_numbers = #tpu.dot_dimension_numbers<[1], [0], [0], [1], [0, 0, 1, 1], [], []>} : vector<8x128xf32>, vector<128x384xf32>, vector<8x384xf32> -> vector<8x384xf32>
    %105 = vector.broadcast %9 : vector<1x384xf32> to vector<8x384xf32>
    %106 = arith.addf %104, %105 : vector<8x384xf32>
    %c0_35 = arith.constant 0 : index
    %c0_36 = arith.constant 0 : index
    %107 = vector.load %arg8[%c0_35, %c0_36] : memref<128x384xf32, #tpu.memory_space<vmem>>, vector<128x384xf32>
    %cst_37 = arith.constant dense<0.000000e+00> : vector<8x384xf32>
    %108 = tpu.matmul %102, %107, %cst_37 {dimension_numbers = #tpu.dot_dimension_numbers<[1], [0], [0], [1], [0, 0, 1, 1], [], []>} : vector<8x128xf32>, vector<128x384xf32>, vector<8x384xf32> -> vector<8x384xf32>
    %109 = vector.broadcast %10 : vector<1x384xf32> to vector<8x384xf32>
    %110 = arith.addf %108, %109 : vector<8x384xf32>
    %111 = vector.extract_strided_slice %106 {offsets = [0, 0], sizes = [8, 128], strides = [1, 1]} : vector<8x384xf32> to vector<8x128xf32>
    %112 = vector.extract_strided_slice %110 {offsets = [0, 0], sizes = [8, 128], strides = [1, 1]} : vector<8x384xf32> to vector<8x128xf32>
    %113 = arith.addf %111, %112 : vector<8x128xf32>
    %114 = arith.negf %113 : vector<8x128xf32>
    %115 = math.exp %114 : vector<8x128xf32>
    %cst_38 = arith.constant 1.000000e+00 : f32
    %116 = vector.broadcast %cst_38 : f32 to vector<8x128xf32>
    %117 = arith.addf %116, %115 : vector<8x128xf32>
    %118 = arith.divf %116, %117 : vector<8x128xf32>
    %119 = vector.extract_strided_slice %106 {offsets = [0, 128], sizes = [8, 128], strides = [1, 1]} : vector<8x384xf32> to vector<8x128xf32>
    %120 = vector.extract_strided_slice %110 {offsets = [0, 128], sizes = [8, 128], strides = [1, 1]} : vector<8x384xf32> to vector<8x128xf32>
    %121 = arith.addf %119, %120 : vector<8x128xf32>
    %122 = arith.negf %121 : vector<8x128xf32>
    %123 = math.exp %122 : vector<8x128xf32>
    %cst_39 = arith.constant 1.000000e+00 : f32
    %124 = vector.broadcast %cst_39 : f32 to vector<8x128xf32>
    %125 = arith.addf %124, %123 : vector<8x128xf32>
    %126 = arith.divf %124, %125 : vector<8x128xf32>
    %127 = vector.extract_strided_slice %106 {offsets = [0, 256], sizes = [8, 128], strides = [1, 1]} : vector<8x384xf32> to vector<8x128xf32>
    %128 = vector.extract_strided_slice %110 {offsets = [0, 256], sizes = [8, 128], strides = [1, 1]} : vector<8x384xf32> to vector<8x128xf32>
    %129 = arith.mulf %118, %128 : vector<8x128xf32>
    %130 = arith.addf %127, %129 : vector<8x128xf32>
    %131 = math.tanh %130 : vector<8x128xf32>
    %cst_40 = arith.constant 1.000000e+00 : f32
    %132 = vector.broadcast %cst_40 : f32 to vector<8x128xf32>
    %133 = arith.subf %132, %126 : vector<8x128xf32>
    %134 = arith.mulf %133, %131 : vector<8x128xf32>
    %135 = arith.mulf %126, %102 : vector<8x128xf32>
    %136 = arith.addf %134, %135 : vector<8x128xf32>
    %cst_41 = arith.constant dense<0.000000e+00> : vector<8xf32>
    %137 = vector.multi_reduction <add>, %136, %cst_41 [1] : vector<8x128xf32> to vector<8xf32>
    %138 = vector.shape_cast %137 : vector<8xf32> to vector<8x1xf32>
    %139 = arith.mulf %136, %136 : vector<8x128xf32>
    %cst_42 = arith.constant dense<0.000000e+00> : vector<8xf32>
    %140 = vector.multi_reduction <add>, %139, %cst_42 [1] : vector<8x128xf32> to vector<8xf32>
    %141 = vector.shape_cast %140 : vector<8xf32> to vector<8x1xf32>
    %cst_43 = arith.constant 3.125000e-02 : f32
    %142 = vector.broadcast %cst_43 : f32 to vector<8x1xf32>
    %143 = arith.mulf %138, %142 : vector<8x1xf32>
    %cst_44 = arith.constant 3.125000e-02 : f32
    %144 = vector.broadcast %cst_44 : f32 to vector<8x1xf32>
    %145 = arith.mulf %141, %144 : vector<8x1xf32>
    %146 = arith.mulf %143, %143 : vector<8x1xf32>
    %147 = arith.subf %145, %146 : vector<8x1xf32>
    %cst_45 = arith.constant 0.000000e+00 : f32
    %148 = vector.broadcast %cst_45 : f32 to vector<8x1xf32>
    %149 = arith.maximumf %147, %148 : vector<8x1xf32>
    %150 = vector.broadcast %143 : vector<8x1xf32> to vector<8x128xf32>
    %151 = arith.subf %136, %150 : vector<8x128xf32>
    %cst_46 = arith.constant 9.99999974E-6 : f32
    %152 = vector.broadcast %cst_46 : f32 to vector<8x1xf32>
    %153 = arith.addf %149, %152 : vector<8x1xf32>
    %154 = math.rsqrt %153 : vector<8x1xf32>
    %155 = vector.broadcast %154 : vector<8x1xf32> to vector<8x128xf32>
    %156 = arith.mulf %151, %155 : vector<8x128xf32>
    %157 = vector.broadcast %11 : vector<1x128xf32> to vector<8x128xf32>
    %158 = arith.mulf %156, %157 : vector<8x128xf32>
    %159 = vector.broadcast %12 : vector<1x128xf32> to vector<8x128xf32>
    %160 = arith.addf %158, %159 : vector<8x128xf32>
    %c0_47 = arith.constant 0 : index
    %c0_48 = arith.constant 0 : index
    %161 = vector.load %arg9[%c0_47, %c0_48] : memref<128x128xf32, #tpu.memory_space<vmem>>, vector<128x128xf32>
    %cst_49 = arith.constant dense<0.000000e+00> : vector<8x128xf32>
    %162 = tpu.matmul %160, %161, %cst_49 {dimension_numbers = #tpu.dot_dimension_numbers<[1], [0], [0], [1], [0, 0, 1, 1], [], []>} : vector<8x128xf32>, vector<128x128xf32>, vector<8x128xf32> -> vector<8x128xf32>
    %163 = vector.broadcast %13 : vector<1x128xf32> to vector<8x128xf32>
    %164 = arith.addf %162, %163 : vector<8x128xf32>
    %c0_50 = arith.constant 0 : index
    %c0_51 = arith.constant 0 : index
    %165 = vector.load %arg4[%c0_50, %c0_51] : memref<8x128xf32, #tpu.memory_space<vmem>>, vector<8x128xf32>
    %cst_52 = arith.constant 0.000000e+00 : f32
    %166 = vector.broadcast %cst_52 : f32 to vector<8x128xf32>
    %167 = arith.cmpf oeq, %165, %166 : vector<8x128xf32>
    %cst_53 = arith.constant -1.000000e+10 : f32
    %168 = vector.broadcast %cst_53 : f32 to vector<8x128xf32>
    %169 = arith.select %167, %168, %164 : vector<8x128xi1>, vector<8x128xf32>
    %cst_54 = arith.constant dense<0xFF800000> : vector<8xf32>
    %170 = vector.multi_reduction <maximumf>, %169, %cst_54 [1] : vector<8x128xf32> to vector<8xf32>
    %171 = vector.shape_cast %170 : vector<8xf32> to vector<8x1xf32>
    %172 = vector.broadcast %171 : vector<8x1xf32> to vector<8x128xf32>
    %173 = arith.subf %169, %172 : vector<8x128xf32>
    %174 = math.exp %173 : vector<8x128xf32>
    %cst_55 = arith.constant dense<0.000000e+00> : vector<8xf32>
    %175 = vector.multi_reduction <add>, %174, %cst_55 [1] : vector<8x128xf32> to vector<8xf32>
    %176 = vector.shape_cast %175 : vector<8xf32> to vector<8x1xf32>
    %177 = vector.broadcast %171 : vector<8x1xf32> to vector<8x128xf32>
    %178 = arith.subf %169, %177 : vector<8x128xf32>
    %179 = math.log %176 : vector<8x1xf32>
    %180 = vector.broadcast %179 : vector<8x1xf32> to vector<8x128xf32>
    %181 = arith.subf %178, %180 : vector<8x128xf32>
    %182 = tpu.iota {dimensions = array<i32: 1>} : vector<8x128xi32>
    %183 = vector.broadcast %171 : vector<8x1xf32> to vector<8x128xf32>
    %184 = arith.cmpf oeq, %169, %183 : vector<8x128xf32>
    %c128_i32 = arith.constant 128 : i32
    %185 = vector.broadcast %c128_i32 : i32 to vector<8x128xi32>
    %186 = arith.select %184, %182, %185 : vector<8x128xi1>, vector<8x128xi32>
    %cst_56 = arith.constant dense<2147483647> : vector<8xi32>
    %187 = vector.multi_reduction <minsi>, %186, %cst_56 [1] : vector<8x128xi32> to vector<8xi32>
    %188 = vector.shape_cast %187 : vector<8xi32> to vector<8x1xi32>
    %189 = vector.broadcast %188 : vector<8x1xi32> to vector<8x128xi32>
    %190 = arith.cmpi eq, %182, %189 : vector<8x128xi32>
    %cst_57 = arith.constant 0.000000e+00 : f32
    %191 = vector.broadcast %cst_57 : f32 to vector<8x128xf32>
    %192 = arith.select %190, %181, %191 : vector<8x128xi1>, vector<8x128xf32>
    %cst_58 = arith.constant dense<0.000000e+00> : vector<8xf32>
    %193 = vector.multi_reduction <add>, %192, %cst_58 [1] : vector<8x128xf32> to vector<8xf32>
    %194 = vector.shape_cast %193 : vector<8xf32> to vector<8x1xf32>
    %195 = tpu.iota {dimensions = array<i32: 1>} : vector<8x128xi32>
    %c126_i32 = arith.constant 126 : i32
    %196 = vector.broadcast %c126_i32 : i32 to vector<8x128xi32>
    %197 = arith.cmpi eq, %195, %196 : vector<8x128xi32>
    %198 = arith.sitofp %188 : vector<8x1xi32> to vector<8x1xf32>
    %cst_59 = arith.constant 0.000000e+00 : f32
    %199 = vector.shape_cast %198 : vector<8x1xf32> to vector<8x1xf32>
    %200 = vector.broadcast %199 : vector<8x1xf32> to vector<8x128xf32>
    %201 = vector.broadcast %cst_59 : f32 to vector<8x128xf32>
    %202 = arith.select %197, %200, %201 : vector<8x128xi1>, vector<8x128xf32>
    %203 = arith.addf %136, %202 : vector<8x128xf32>
    %c127_i32 = arith.constant 127 : i32
    %204 = vector.broadcast %c127_i32 : i32 to vector<8x128xi32>
    %205 = arith.cmpi eq, %195, %204 : vector<8x128xi32>
    %cst_60 = arith.constant 0.000000e+00 : f32
    %206 = vector.shape_cast %194 : vector<8x1xf32> to vector<8x1xf32>
    %207 = vector.broadcast %206 : vector<8x1xf32> to vector<8x128xf32>
    %208 = vector.broadcast %cst_60 : f32 to vector<8x128xf32>
    %209 = arith.select %205, %207, %208 : vector<8x128xi1>, vector<8x128xf32>
    %210 = arith.addf %203, %209 : vector<8x128xf32>
    %c0_61 = arith.constant 0 : index
    %c0_62 = arith.constant 0 : index
    %211 = vector.load %arg11[%c0_61, %c0_62] : memref<8x128xf32, #tpu.memory_space<vmem>>, vector<8x128xf32>
    tpu.vector_store %arg11[%c0_61, %c0_62], %210 {strides = array<i32>} : memref<8x128xf32, #tpu.memory_space<vmem>>, vector<8x128xf32>,
    return
  }
  func.func @transform_0(%arg0: i32) -> (i32, i32) {
    %c0_i32 = arith.constant 0 : i32
    %c0_i32_0 = arith.constant 0 : i32
    return %arg0, %c0_i32 : i32, i32
  }
  func.func @transform_1(%arg0: i32) -> (i32, i32) {
    %c0_i32 = arith.constant 0 : i32
    %c0_i32_0 = arith.constant 0 : i32
    return %arg0, %c0_i32 : i32, i32
  }
  func.func @transform_2(%arg0: i32) -> (i32, i32) {
    %c0_i32 = arith.constant 0 : i32
    %c0_i32_0 = arith.constant 0 : i32
    return %arg0, %c0_i32 : i32, i32
  }
  func.func @transform_3(%arg0: i32) -> (i32, i32) {
    %c0_i32 = arith.constant 0 : i32
    %c0_i32_0 = arith.constant 0 : i32
    return %arg0, %c0_i32 : i32, i32
  }
  func.func @transform_4(%arg0: i32) -> (i32, i32) {
    %c0_i32 = arith.constant 0 : i32
    %c0_i32_0 = arith.constant 0 : i32
    %c0_i32_1 = arith.constant 0 : i32
    return %c0_i32, %c0_i32_0 : i32, i32
  }
  func.func @transform_5(%arg0: i32) -> (i32, i32) {
    %c0_i32 = arith.constant 0 : i32
    %c0_i32_0 = arith.constant 0 : i32
    %c0_i32_1 = arith.constant 0 : i32
    return %c0_i32, %c0_i32_0 : i32, i32
  }
  func.func @transform_6(%arg0: i32) -> (i32, i32) {
    %c0_i32 = arith.constant 0 : i32
    %c0_i32_0 = arith.constant 0 : i32
    %c0_i32_1 = arith.constant 0 : i32
    return %c0_i32, %c0_i32_0 : i32, i32
  }
  func.func @transform_7(%arg0: i32) -> (i32, i32) {
    %c0_i32 = arith.constant 0 : i32
    %c0_i32_0 = arith.constant 0 : i32
    %c0_i32_1 = arith.constant 0 : i32
    return %c0_i32, %c0_i32_0 : i32, i32
  }
  func.func @transform_8(%arg0: i32) -> (i32, i32) {
    %c0_i32 = arith.constant 0 : i32
    %c0_i32_0 = arith.constant 0 : i32
    %c0_i32_1 = arith.constant 0 : i32
    return %c0_i32, %c0_i32_0 : i32, i32
  }
  func.func @transform_9(%arg0: i32) -> (i32, i32) {
    %c0_i32 = arith.constant 0 : i32
    %c0_i32_0 = arith.constant 0 : i32
    %c0_i32_1 = arith.constant 0 : i32
    return %c0_i32, %c0_i32_0 : i32, i32
  }
  func.func @transform_10(%arg0: i32) -> (i32, i32) {
    %c0_i32 = arith.constant 0 : i32
    %c0_i32_0 = arith.constant 0 : i32
    return %arg0, %c0_i32 : i32, i32
  }
}

</mosaic_0001>

<bundles_post_ra>
// kernel: r_actor_forward.1
= control target key start
LH: loop header
LB: loop body
LE: loop exit
PB: predicated region body
PF: predicated region fallthrough
CT: control target
= control target key end

     0   :  { %15 = vsyncpa [#allocation3], 0  ;;  %s1855_s0 = inlined_call_operand.vmem [shape: f32[8,128], index: 0, kind: input, shape index: {}]   ;;  %s1856_s1 = inlined_call_operand.vmem [shape: f32[8,128], index: 1, kind: input, shape index: {}]   ;;  %s1857_s2 = inlined_call_operand.vmem [shape: f32[8,1], index: 2, kind: input, shape index: {}]   ;;  %s1858_s3 = inlined_call_operand.vmem [shape: f32[8,128], index: 3, kind: input, shape index: {}]   ;;  %s1859_s4 = inlined_call_operand.hbm [shape: f32[128,128], index: 4, kind: input, shape index: {}]   ;;  %s1860_s5 = inlined_call_operand.hbm [shape: f32[128,128], index: 5, kind: input, shape index: {}]   ;;  %s1861_s6 = inlined_call_operand.hbm [shape: f32[128,384], index: 6, kind: input, shape index: {}]   ;;  %s1862_s7 = inlined_call_operand.hbm [shape: f32[128,384], index: 7, kind: input, shape index: {}]   ;;  %s1863_s8 = inlined_call_operand.hbm [shape: f32[128,128], index: 8, kind: input, shape index: {}]   ;;  %s1864_s9 = inlined_call_operand.vmem [shape: f32[16,384], index: 9, kind: input, shape index: {}]   ;;  %s1865_s10 = inlined_call_operand.vmem [shape: f32[8,128], index: 10, kind: output, shape index: {}]  }
   0x1   :  { %16 = vsyncpa [#allocation5], 0 }
   0x2   :  { %17 = vsyncpa [#allocation8], 0  ;;  %s1561_s13 = smov [#allocation4]   ;;  %s1445_s17 = scalar_lea.hbm %s1860_s5, 2048 }
   0x3   :  { %s43_s14 = sshll.u32 %s1561_s13, 4  ;;  %p1446_p0 = scmp.ne.s32.totalorder %s1860_s5, %s1445_s17  ;;  %s44_s14 = int_to_ptr.vmem [resolvable:$true] %s43_s14 }
   0x4   :  { %p1449_p1 = scmp.lt.u32.totalorder %s1445_s17, %s1860_s5 }
   0x6   :  { %p1451_p2 = pnand %p1449_p1, %p1446_p0 }
   0x8   :  { %1454 = shalt.err (!%p1451_p2)
}
   0x9   :  { %s1455_s22 = scalar_lea.vmem %s44_s14, 2048  ;;  %p1460_p4 = scmp.lt.s32.totalorder %s44_s14, %s44_s14 }
   0xa   :  { %p1456_p3 = scmp.ne.s32.totalorder %s44_s14, %s1455_s22  ;;  %p1461_p5 = scmp.lt.s32.totalorder %s1455_s22, %s1455_s22 }
   0xc   :  { %p1462_p6 = por %p1461_p5, %p1460_p4 }
   0xe   :  { %p1463_p7 = pnand %p1462_p6, %p1456_p3 }
  0x10   :  { %1466 = shalt.err (!%p1463_p7)
}
  0x11   :  { %s1562_s23 = smov 128   ;;  %s1563_s24 = smov 8  }
  0x12   :  { %49 = dma.hbm_to_vmem [thread:$0]  %s1860_s5, 2048, %s44_s14, [#allocation5], %s1562_s23, %s1562_s23, %s1563_s24  }
  0x13   :  { %s1564_s27 = smov [#allocation7]   ;;  %s1565_s29 = smov [#allocation2]  }
  0x14   :  { %s67_s28 = sshll.u32 %s1564_s27, 4  ;;  %s31_s30 = sshll.u32 %s1565_s29, 4  ;;  %s68_s28 = int_to_ptr.vmem [resolvable:$true] %s67_s28  ;;  %s32_s30 = int_to_ptr.vmem [resolvable:$true] %s31_s30 }
  0x15   :  { %s1467_s13 = scalar_lea.hbm %s1862_s7, 6144 }
  0x16   :  { %p1468_p8 = scmp.ne.s32.totalorder %s1862_s7, %s1467_s13  ;;  %p1471_p9 = scmp.lt.u32.totalorder %s1467_s13, %s1862_s7 }
  0x18   :  { %p1473_p10 = pnand %p1471_p9, %p1468_p8 }
  0x1a   :  { %1476 = shalt.err (!%p1473_p10)
}
  0x1b   :  { %s1477_s5 = scalar_lea.vmem %s68_s28, 6144  ;;  %p1482_p12 = scmp.lt.s32.totalorder %s68_s28, %s68_s28 }
  0x1c   :  { %p1478_p11 = scmp.ne.s32.totalorder %s68_s28, %s1477_s5  ;;  %p1483_p13 = scmp.lt.s32.totalorder %s1477_s5, %s1477_s5 }
  0x1e   :  { %p1484_p0 = por %p1483_p13, %p1482_p12 }
  0x20   :  { %p1485_p1 = pnand %p1484_p0, %p1478_p11 }
  0x22   :  { %1488 = shalt.err (!%p1485_p1)
}
  0x23   :  { %s1566_s14 = smov 384   ;;  %s1567_s19 = smov 24  }
  0x24   :  { %73 = dma.hbm_to_vmem [thread:$0]  %s1862_s7, 6144, %s68_s28, [#allocation8], %s1566_s14, %s1566_s14, %s1567_s19  }
  0x25   :  { %s1489_s26 = scalar_lea.hbm %s1859_s4, 2048 }
  0x26   :  { %p1490_p2 = scmp.ne.s32.totalorder %s1859_s4, %s1489_s26  ;;  %p1493_p3 = scmp.lt.u32.totalorder %s1489_s26, %s1859_s4 }
  0x28   :  { %p1495_p4 = pnand %p1493_p3, %p1490_p2 }
  0x2a   :  { %1498 = shalt.err (!%p1495_p4)
}
  0x2b   :  { %s1499_s13 = scalar_lea.vmem %s32_s30, 2048  ;;  %p1504_p6 = scmp.lt.s32.totalorder %s32_s30, %s32_s30 }
  0x2c   :  { %p1500_p5 = scmp.ne.s32.totalorder %s32_s30, %s1499_s13  ;;  %p1505_p7 = scmp.lt.s32.totalorder %s1499_s13, %s1499_s13 }
  0x2e   :  { %p1506_p8 = por %p1505_p7, %p1504_p6 }
  0x30   :  { %p1507_p9 = pnand %p1506_p8, %p1500_p5 }
  0x32   :  { %1510 = shalt.err (!%p1507_p9)
}
  0x33   :  { %37 = dma.hbm_to_vmem [thread:$0]  %s1859_s4, 2048, %s32_s30, [#allocation3], %s1562_s23, %s1562_s23, %s1563_s24  }
  0x34   :  { %s1568_s15 = smov [#allocation6]   ;;  %s1569_s17 = smov [#allocation9]  }
  0x35   :  { %s55_s16 = sshll.u32 %s1568_s15, 4  ;;  %s79_s18 = sshll.u32 %s1569_s17, 4  ;;  %s56_s16 = int_to_ptr.vmem [resolvable:$true] %s55_s16  ;;  %s80_s18 = int_to_ptr.vmem [resolvable:$true] %s79_s18 }
  0x36   :  { %s1511_s21 = scalar_lea.hbm %s1861_s6, 6144 }
  0x37   :  { %p1512_p10 = scmp.ne.s32.totalorder %s1861_s6, %s1511_s21  ;;  %p1515_p11 = scmp.lt.u32.totalorder %s1511_s21, %s1861_s6 }
  0x39   :  { %p1517_p12 = pnand %p1515_p11, %p1512_p10 }
  0x3b   :  { %1520 = shalt.err (!%p1517_p12)
}
  0x3c   :  { %s1521_s4 = scalar_lea.vmem %s56_s16, 6144  ;;  %p1526_p0 = scmp.lt.s32.totalorder %s56_s16, %s56_s16 }
  0x3d   :  { %p1522_p13 = scmp.ne.s32.totalorder %s56_s16, %s1521_s4  ;;  %p1527_p1 = scmp.lt.s32.totalorder %s1521_s4, %s1521_s4 }
  0x3f   :  { %p1528_p2 = por %p1527_p1, %p1526_p0 }
  0x41   :  { %p1529_p3 = pnand %p1528_p2, %p1522_p13 }
  0x43   :  { %1532 = shalt.err (!%p1529_p3)
}
  0x44   :  { %61 = dma.hbm_to_vmem [thread:$0]  %s1861_s6, 6144, %s56_s16, [#allocation5], %s1566_s14, %s1566_s14, %s1567_s19  }
  0x45   :  { %s1533_s13 = scalar_lea.hbm %s1863_s8, 2048 }
  0x46   :  { %p1534_p4 = scmp.ne.s32.totalorder %s1863_s8, %s1533_s13  ;;  %p1537_p5 = scmp.lt.u32.totalorder %s1533_s13, %s1863_s8 }
  0x48   :  { %p1539_p6 = pnand %p1537_p5, %p1534_p4 }
  0x4a   :  { %1542 = shalt.err (!%p1539_p6)
}
  0x4b   :  { %s1543_s5 = scalar_lea.vmem %s80_s18, 2048  ;;  %p1548_p8 = scmp.lt.s32.totalorder %s80_s18, %s80_s18 }
  0x4c   :  { %p1544_p7 = scmp.ne.s32.totalorder %s80_s18, %s1543_s5  ;;  %p1549_p9 = scmp.lt.s32.totalorder %s1543_s5, %s1543_s5 }
  0x4e   :  { %p1550_p10 = por %p1549_p9, %p1548_p8 }
  0x50   :  { %p1551_p11 = pnand %p1550_p10, %p1544_p7 }
  0x52   :  { %1554 = shalt.err (!%p1551_p11)
}
  0x53   :  { %85 = dma.hbm_to_vmem [thread:$0]  %s1863_s8, 2048, %s80_s18, [#allocation8], %s1562_s23, %s1562_s23, %s1563_s24  }
  0x54   :  { %1555 = dma.done.wait [#allocation3], 2048  }
  0x55   :  { %1556 = vsyncadd [#allocation3], 4294965248 }
  0x56   :  { %1557 = dma.done.wait [#allocation5], 8192  }
  0x57   :  { %1558 = vsyncadd [#allocation5], 4294959104 }
  0x58   :  { %1559 = dma.done.wait [#allocation8], 8192  }
  0x59   :  { %1560 = vsyncadd [#allocation8], 4294959104  ;;  %v1570_v0 = vmov 0.0|0.0   ;;  %v1709_v1 = vld [vmem:[%s1855_s0] sm:$0xff]  ;;  %v133_v3 = vld [vmem:[#allocation2 + $0x8] sm:$0xff]  ;;  %vm1571_vm0 = vmmov 0   ;;  %v122_v35 = vlaneseq }
  0x5a   :  { %1219 = vmatprep.subr.bf16.mxu0 %v1570_v0  ;;  %1243 = vmatprep.subr.bf16.mxu1 %v1570_v0  ;;  %v132_v2 = vld [vmem:[#allocation2] sm:$0xff]  ;;  %v110_v4 = vmul.f32 %v1709_v1, %v1709_v1  ;;  %v134_v6 = vld [vmem:[#allocation2 + $0x10] sm:$0xff]  ;;  %v135_v7 = vld [vmem:[#allocation2 + $0x18] sm:$0xff]  ;;  %v1572_v20 = vmov 0.0  }
  0x5b   :  { %108 = vadd.xlane.f32.xlu0 %v1709_v1  ;;  %v1220_v5 = vpack.c.bf16 %v133_v3, %v132_v2  ;;  %v1223_v8 = vpack.c.bf16 %v135_v7, %v134_v6  ;;  %v136_v9 = vld [vmem:[#allocation2 + $0x20] sm:$0xff]  ;;  %v137_v10 = vld [vmem:[#allocation2 + $0x28] sm:$0xff]  ;;  %v138_v12 = vld [vmem:[#allocation2 + $0x30] sm:$0xff]  ;;  %1076 = vmatprep.mubr.msk.f32.mxu0 %vm1571_vm0, %v1572_v20  ;;  %v1726_v37 = vshrl.u32 %v122_v35, 7 }
  0x5c   :  { %v1226_v11 = vpack.c.bf16 %v137_v10, %v136_v9  ;;  %v139_v13 = vld [vmem:[#allocation2 + $0x38] sm:$0xff]  ;;  %v140_v15 = vld [vmem:[#allocation2 + $0x40] sm:$0xff]  ;;  %v141_v16 = vld [vmem:[#allocation2 + $0x48] sm:$0xff]  ;;  %1111 = vmatprep.mubr.msk.f32.mxu1 %vm1571_vm0, %v1572_v20 }
  0x5d   :  { %1221 = vmatpush3.bf16.msra.mxu0 %v1220_v5  ;;  %v1229_v14 = vpack.c.bf16 %v139_v13, %v138_v12  ;;  %v1232_v17 = vpack.c.bf16 %v141_v16, %v140_v15  ;;  %v142_v18 = vld [vmem:[#allocation2 + $0x50] sm:$0xff]  ;;  %v143_v19 = vld [vmem:[#allocation2 + $0x58] sm:$0xff]  ;;  %v144_v22 = vld [vmem:[#allocation2 + $0x60] sm:$0xff]  ;;  %v1729_v38 = vsub.s32 0, %v1726_v37  ;;  %v1737_v40 = vsub.s32 1, %v1726_v37 }
  0x5e   :  { %1222 = vmatprep.subr.bf16.mxu0 %v1570_v0  ;;  %v1235_v21 = vpack.c.bf16 %v143_v19, %v142_v18  ;;  %v145_v23 = vld [vmem:[#allocation2 + $0x68] sm:$0xff]  ;;  %v146_v25 = vld [vmem:[#allocation2 + $0x70] sm:$0xff]  ;;  %v147_v26 = vld [vmem:[#allocation2 + $0x78] sm:$0xff]  ;;  %v150_v51 = vsub.s32 2, %v1726_v37 }
  0x5f   :  { %111 = vadd.xlane.f32.xlu0 %v110_v4  ;;  %v1238_v24 = vpack.c.bf16 %v145_v23, %v144_v22  ;;  %v1241_v27 = vpack.c.bf16 %v147_v26, %v146_v25  ;;  %v1734_v39 = vld [vmem:[%s1864_s9] sm:$0xff]  ;;  %v248_v49 = vld [vmem:[#allocation4 + $0x8] sm:$0xff]  ;;  %v249_v58 = vld [vmem:[#allocation4 + $0x10] sm:$0xff]  ;;  %v239_v25 = vsub.s32 3, %v1726_v37  ;;  %v244_v26 = vsub.s32 4, %v1726_v37 }
  0x60   :  { %v125_v42 = vrot.slane %v1734_v39, %v1729_v38  ;;  %v130_v45 = vrot.slane %v1734_v39, %v1737_v40  ;;  %v247_v48 = vld [vmem:[#allocation4] sm:$0xff]  ;;  %v151_v52 = vrot.slane %v1734_v39, %v150_v51  ;;  %v250_v59 = vld [vmem:[#allocation4 + $0x18] sm:$0xff]  ;;  %v252_v62 = vld [vmem:[#allocation4 + $0x28] sm:$0xff] }
  0x61   :  { %1224 = vmatpush3.bf16.msra.mxu0 %v1223_v8  ;;  %v1244_v50 = vpack.c.bf16 %v248_v49, %v247_v48  ;;  %v1247_v60 = vpack.c.bf16 %v250_v59, %v249_v58  ;;  %v251_v61 = vld [vmem:[#allocation4 + $0x20] sm:$0xff]  ;;  %v254_v2 = vld [vmem:[#allocation4 + $0x38] sm:$0xff]  ;;  %v256_v5 = vld [vmem:[#allocation4 + $0x48] sm:$0xff]  ;;  %v265_v59 = vsub.s32 5, %v1726_v37 }
  0x62   :  { %1225 = vmatprep.subr.bf16.mxu0 %v1570_v0  ;;  %v1250_v63 = vpack.c.bf16 %v252_v62, %v251_v61  ;;  %v255_v4 = vld [vmem:[#allocation4 + $0x40] sm:$0xff]  ;;  %v257_v7 = vld [vmem:[#allocation4 + $0x50] sm:$0xff]  ;;  %v258_v8 = vld [vmem:[#allocation4 + $0x58] sm:$0xff] }
  0x63   :  { %1245 = vmatpush3.bf16.msra.mxu1 %v1244_v50  ;;  %v1256_v6 = vpack.c.bf16 %v256_v5, %v255_v4  ;;  %v1259_v9 = vpack.c.bf16 %v258_v8, %v257_v7  ;;  %v259_v10 = vld [vmem:[#allocation4 + $0x60] sm:$0xff]  ;;  %v261_v13 = vld [vmem:[#allocation4 + $0x70] sm:$0xff]  ;;  %v377_v49 = vld [vmem:[#allocation6 + $0x38] sm:$0xff] }
  0x64   :  { %1246 = vmatprep.subr.bf16.mxu1 %v1570_v0  ;;  %v380_v50 = vld [vmem:[#allocation6 + $0x50] sm:$0xff]  ;;  %v386_v4 = vld [vmem:[#allocation6 + $0x80] sm:$0xff]  ;;  %v385_v7 = vld [vmem:[#allocation6 + $0x78] sm:$0xff] }
  0x65   :  { %1227 = vmatpush3.bf16.msra.mxu0 %v1226_v11  ;;  %v260_v11 = vld [vmem:[#allocation4 + $0x68] sm:$0xff]  ;;  %v384_v8 = vld [vmem:[#allocation6 + $0x70] sm:$0xff] }
  0x66   :  { %1228 = vmatprep.subr.bf16.mxu0 %v1570_v0  ;;  %v1262_v12 = vpack.c.bf16 %v260_v11, %v259_v10  ;;  %v387_v10 = vld [vmem:[#allocation6 + $0x88] sm:$0xff] }
  0x67   :  { %1248 = vmatpush3.bf16.msra.mxu1 %v1247_v60  ;;  %v266_v60 = vrot.slane %v1734_v39, %v265_v59  ;;  %v1306_v11 = vpack.c.bf16 %v387_v10, %v384_v8 }
  0x68   :  { %1249 = vmatprep.subr.bf16.mxu1 %v1570_v0 }
  0x69   :  { %1230 = vmatpush3.bf16.msra.mxu0 %v1229_v14  ;;  %v262_v14 = vld [vmem:[#allocation4 + $0x78] sm:$0xff] }
  0x6a   :  { %1231 = vmatprep.subr.bf16.mxu0 %v1570_v0  ;;  %v1265_v15 = vpack.c.bf16 %v262_v14, %v261_v13  ;;  %v392_v13 = vld [vmem:[#allocation6 + $0xb0] sm:$0xff] }
  0x6b   :  { %1251 = vmatpush3.bf16.msra.mxu1 %v1250_v63 }
  0x6c   :  { %1252 = vmatprep.subr.bf16.mxu1 %v1570_v0 }
  0x6d   :  { %1233 = vmatpush3.bf16.msra.mxu0 %v1232_v17 }
  0x6e   :  { %1234 = vmatprep.subr.bf16.mxu0 %v1570_v0 }
  0x71   :  { %1236 = vmatpush3.bf16.msra.mxu0 %v1235_v21 }
  0x72   :  { %1237 = vmatprep.subr.bf16.mxu0 %v1570_v0 }
  0x75   :  { %1239 = vmatpush3.bf16.msra.mxu0 %v1238_v24 }
  0x76   :  { %1240 = vmatprep.subr.bf16.mxu0 %v1570_v0 }
  0x79   :  { %1242 = vmatpush3.bf16.msra.mxu0 %v1241_v27 }
  0xe8   :  { %v109_v28 = vpop.xlane.xlu0 %108 }
  0xe9   :  { %v113_v29 = vmul.f32 0.0625, %v109_v28  ;;  %v240_v28 = vrot.slane %v1734_v39, %v239_v25 }
  0xeb   :  { %v115_v31 = vmul.f32 %v113_v29, %v113_v29  ;;  %v118_v41 = vsub.f32 %v1709_v1, %v113_v29  ;;  %v253_v1 = vld [vmem:[#allocation4 + $0x30] sm:$0xff] }
  0xec   :  { %v112_v30 = vpop.xlane.xlu0 %111  ;;  %v1253_v3 = vpack.c.bf16 %v254_v2, %v253_v1 }
  0xed   :  { %v114_v32 = vmul.f32 0.0625, %v112_v30 }
  0xee   :  { %1254 = vmatpush3.bf16.msra.mxu1 %v1253_v3  ;;  %v383_v3 = vld [vmem:[#allocation6 + $0x68] sm:$0xff] }
  0xef   :  { %v116_v33 = vsub.f32 %v114_v32, %v115_v31  ;;  %1255 = vmatprep.subr.bf16.mxu1 %v1570_v0  ;;  %v245_v31 = vrot.slane %v1734_v39, %v244_v26  ;;  %v1275_v5 = vpack.c.bf16 %v386_v4, %v383_v3  ;;  %v572_v3 = vld [vmem:[#allocation7 + $0x8] sm:$0xff]  ;;  %v575_v4 = vld [vmem:[#allocation7 + $0x20] sm:$0xff] }
  0xf1   :  { %v117_v34 = vmax.f32 %v116_v33, 0.0 }
  0xf2   :  { %1257 = vmatpush3.bf16.msra.mxu1 %v1256_v6  ;;  %v382_v6 = vld [vmem:[#allocation6 + $0x60] sm:$0xff] }
  0xf3   :  { %v119_v36 = vadd.f32 1e-05, %v117_v34  ;;  %1258 = vmatprep.subr.bf16.mxu1 %v1570_v0  ;;  %v1573_v34 = vmov 0  }
  0xf4   :  { %1422 = vset.pattern.permute.xlu0 %v1573_v34  ;;  %v401_v34 = vld [vmem:[#allocation6 + $0xf8] sm:$0xff] }
  0xf5   :  { %1423 = vrsqrt.f32 %v119_v36  ;;  %v371_v36 = vld [vmem:[#allocation6 + $0x8] sm:$0xff] }
  0xf6   :  { %1260 = vmatpush3.bf16.msra.mxu1 %v1259_v9  ;;  %v1277_v9 = vpack.c.bf16 %v385_v7, %v382_v6  ;;  %v1323_v7 = vpack.c.bf16 %v575_v4, %v572_v3 }
  0xf7   :  { %1261 = vmatprep.subr.bf16.mxu1 %v1570_v0 }
  0xfa   :  { %1263 = vmatpush3.bf16.msra.mxu1 %v1262_v12  ;;  %v389_v12 = vld [vmem:[#allocation6 + $0x98] sm:$0xff] }
  0xfb   :  { %1264 = vmatprep.subr.bf16.mxu1 %v1570_v0  ;;  %v1279_v14 = vpack.c.bf16 %v392_v13, %v389_v12 }
  0xfe   :  { %1266 = vmatpush3.bf16.msra.mxu1 %v1265_v15  ;;  %v388_v15 = vld [vmem:[#allocation6 + $0x90] sm:$0xff] }
  0xff   :  { %v1424_v43 = vpop.eup %1423  ;;  %1299 = vmatprep.subr.bf16.mxu1 %v1570_v0 }
 0x100   :  { %v121_v44 = vmul.f32 %v1424_v43, %v118_v41  ;;  %v374_v41 = vld [vmem:[#allocation6 + $0x20] sm:$0xff] }
 0x101   :  { %v1267_v43 = vpack.c.bf16 %v374_v41, %v371_v36  ;;  %v404_v36 = vld [vmem:[#allocation6 + $0x110] sm:$0xff] }
 0x102   :  { %v126_v46 = vmul.f32 %v125_v42, %v121_v44  ;;  %v370_v42 = vld [vmem:[#allocation6] sm:$0xff]  ;;  %v373_v44 = vld [vmem:[#allocation6 + $0x18] sm:$0xff]  ;;  %v400_v41 = vld [vmem:[#allocation6 + $0xf0] sm:$0xff] }
 0x103   :  { %1268 = vmatprep.subr.bf16.mxu0 %v1267_v43  ;;  %v403_v43 = vld [vmem:[#allocation6 + $0x108] sm:$0xff] }
 0x104   :  { %v131_v47 = vadd.f32 %v130_v45, %v126_v46  ;;  %v372_v45 = vld [vmem:[#allocation6 + $0x10] sm:$0xff]  ;;  %v375_v46 = vld [vmem:[#allocation6 + $0x28] sm:$0xff] }
 0x105   :  { %v1300_v48 = vpack.c.bf16 %v375_v46, %v372_v45  ;;  %v405_v45 = vld [vmem:[#allocation6 + $0x118] sm:$0xff]  ;;  %v1289_v46 = vpack.c.bf16 %v403_v43, %v400_v41  ;;  %v580_v43 = vld [vmem:[#allocation7 + $0x48] sm:$0xff] }
 0x106   :  { %1077 = vmatmul.mubr.f32.vlgmr.msra.gmra.mrb[0].mxu0 %v131_v47  ;;  %v1269_v47 = vpack.c.bf16 %v373_v44, %v370_v42  ;;  %v1287_v42 = vpack.c.bf16 %v404_v36, %v401_v34  ;;  %v402_v44 = vld [vmem:[#allocation6 + $0x100] sm:$0xff]  ;;  %v577_v36 = vld [vmem:[#allocation7 + $0x30] sm:$0xff] }
 0x107   :  { %494 = vmatprep.mubr.f32.mxu0 %v1572_v20 }
 0x108   :  { %1270 = vmatpush1.bf16.msra.mxu0 %v1269_v47  ;;  %v1315_v47 = vpack.c.bf16 %v405_v45, %v402_v44  ;;  %v582_v44 = vld [vmem:[#allocation7 + $0x58] sm:$0xff]  ;;  %v584_v45 = vld [vmem:[#allocation7 + $0x68] sm:$0xff] }
 0x1d9   :  { %v218_v53 = vpop.f32.mrb[0].mxu0 }
 0x1da   :  { %v219_v54 = vadd.f32 %v218_v53, %v151_v52  ;;  %v1078_v55 = vpop.f32.mrb[1].mxu0  ;;  %v376_v52 = vld [vmem:[#allocation6 + $0x30] sm:$0xff]  ;;  %v1271_v53 = vpack.c.bf16 %v380_v50, %v377_v49  ;;  %v410_v49 = vld [vmem:[#allocation6 + $0x140] sm:$0xff] }
 0x1db   :  { %v378_v55 = vld [vmem:[#allocation6 + $0x40] sm:$0xff] }
 0x1dc   :  { %v222_v56 = vmax.f32 %v219_v54, 0.0  ;;  %v379_v54 = vld [vmem:[#allocation6 + $0x48] sm:$0xff]  ;;  %1272 = vmatprep.subr.bf16.mxu0 %v1271_v53  ;;  %v406_v50 = vld [vmem:[#allocation6 + $0x120] sm:$0xff]  ;;  %v409_v53 = vld [vmem:[#allocation6 + $0x138] sm:$0xff] }
 0x1de   :  { %223 = vadd.xlane.f32.xlu1 %v222_v56  ;;  %v225_v57 = vmul.f32 %v222_v56, %v222_v56 }
 0x1e2   :  { %226 = vadd.xlane.f32.xlu1 %v225_v57  ;;  %v1273_v57 = vpack.c.bf16 %v379_v54, %v376_v52  ;;  %v408_v54 = vld [vmem:[#allocation6 + $0x130] sm:$0xff] }
 0x1e4   :  { %1274 = vmatpush1.bf16.msra.mxu0 %v1273_v57  ;;  %v416_v57 = vld [vmem:[#allocation6 + $0x170] sm:$0xff] }
 0x1e5   :  { %1276 = vmatprep.subr.bf16.mxu0 %v1275_v5 }
 0x1e8   :  { %1278 = vmatpush1.bf16.msra.mxu0 %v1277_v9 }
 0x1e9   :  { %1280 = vmatprep.subr.bf16.mxu0 %v1279_v14 }
 0x26b   :  { %v224_v16 = vpop.xlane.xlu1 %223 }
 0x26c   :  { %v228_v17 = vmul.f32 0.03125, %v224_v16  ;;  %v391_v16 = vld [vmem:[#allocation6 + $0xa8] sm:$0xff] }
 0x26e   :  { %v230_v19 = vmul.f32 %v228_v17, %v228_v17  ;;  %v233_v27 = vsub.f32 %v222_v56, %v228_v17  ;;  %v381_v56 = vld [vmem:[#allocation6 + $0x58] sm:$0xff]  ;;  %v390_v17 = vld [vmem:[#allocation6 + $0xa0] sm:$0xff] }
 0x26f   :  { %v227_v18 = vpop.xlane.xlu1 %226  ;;  %v1303_v58 = vpack.c.bf16 %v381_v56, %v378_v55  ;;  %v411_v55 = vld [vmem:[#allocation6 + $0x148] sm:$0xff]  ;;  %v413_v56 = vld [vmem:[#allocation6 + $0x158] sm:$0xff] }
 0x270   :  { %v229_v21 = vmul.f32 0.03125, %v227_v18  ;;  %v363_v18 = vld [vmem:[%s1857_s2] sm:$0xff]  ;;  %v1318_v59 = vpack.c.bf16 %v411_v55, %v408_v54  ;;  %v590_v54 = vld [vmem:[#allocation7 + $0x98] sm:$0xff]  ;;  %v593_v55 = vld [vmem:[#allocation7 + $0xb0] sm:$0xff] }
 0x272   :  { %v231_v22 = vsub.f32 %v229_v21, %v230_v19  ;;  %v1281_v19 = vpack.c.bf16 %v391_v16, %v388_v15  ;;  %v393_v21 = vld [vmem:[#allocation6 + $0xb8] sm:$0xff]  ;;  %v354_v16 = vsub.s32 6, %v1726_v37 }
 0x274   :  { %v232_v23 = vmax.f32 %v231_v22, 0.0  ;;  %v1309_v22 = vpack.c.bf16 %v393_v21, %v390_v17  ;;  %1282 = vmatpush1.bf16.msra.mxu0 %v1281_v19  ;;  %v359_v17 = vsub.s32 7, %v1726_v37  ;;  %v355_v19 = vrot.slane %v1734_v39, %v354_v16  ;;  %v604_v16 = vld [vmem:[#allocation7 + $0x108] sm:$0xff] }
 0x276   :  { %v234_v24 = vadd.f32 1e-05, %v232_v23  ;;  %v395_v23 = vld [vmem:[#allocation6 + $0xc8] sm:$0xff] }
 0x278   :  { %1425 = vrsqrt.f32 %v234_v24  ;;  %v398_v24 = vld [vmem:[#allocation6 + $0xe0] sm:$0xff] }
 0x282   :  { %v1426_v29 = vpop.eup %1425 }
 0x283   :  { %v236_v30 = vmul.f32 %v1426_v29, %v233_v27  ;;  %v1283_v27 = vpack.c.bf16 %v398_v24, %v395_v23  ;;  %v397_v29 = vld [vmem:[#allocation6 + $0xd8] sm:$0xff]  ;;  %v360_v24 = vrot.slane %v1734_v39, %v359_v17  ;;  %v1329_v39 = vpack.c.bf16 %v580_v43, %v577_v36  ;;  %v603_v17 = vld [vmem:[#allocation7 + $0x100] sm:$0xff]  ;;  %v613_v36 = vld [vmem:[#allocation7 + $0x150] sm:$0xff] }
 0x284   :  { %v615_v43 = vld [vmem:[#allocation7 + $0x160] sm:$0xff] }
 0x285   :  { %v241_v32 = vmul.f32 %v240_v28, %v236_v30  ;;  %v394_v28 = vld [vmem:[#allocation6 + $0xc0] sm:$0xff]  ;;  %v396_v30 = vld [vmem:[#allocation6 + $0xd0] sm:$0xff]  ;;  %1284 = vmatprep.subr.bf16.mxu0 %v1283_v27  ;;  %v574_v27 = vld [vmem:[#allocation7 + $0x18] sm:$0xff] }
 0x287   :  { %v246_v33 = vadd.f32 %v245_v31, %v241_v32  ;;  %v1285_v31 = vpack.c.bf16 %v397_v29, %v394_v28  ;;  %v399_v32 = vld [vmem:[#allocation6 + $0xe8] sm:$0xff]  ;;  %v573_v28 = vld [vmem:[#allocation7 + $0x10] sm:$0xff] }
 0x288   :  { %v576_v29 = vld [vmem:[#allocation7 + $0x28] sm:$0xff] }
 0x289   :  { %1112 = vmatmul.mubr.f32.vlgmr.msra.gmra.mrb[0].mxu1 %v246_v33  ;;  %v1312_v33 = vpack.c.bf16 %v399_v32, %v396_v30  ;;  %1286 = vmatpush1.bf16.msra.mxu0 %v1285_v31  ;;  %v578_v30 = vld [vmem:[#allocation7 + $0x38] sm:$0xff]  ;;  %v581_v31 = vld [vmem:[#allocation7 + $0x50] sm:$0xff]  ;;  %v1356_v34 = vpack.c.bf16 %v576_v29, %v573_v28 }
 0x28a   :  { %1146 = vmatprep.mubr.msk.f32.mxu1 %vm1571_vm0, %v1572_v20  ;;  %1301 = vmatpush3.bf16.msra.mxu1 %v1300_v48  ;;  %v407_v48 = vld [vmem:[#allocation6 + $0x128] sm:$0xff]  ;;  %v610_v28 = vld [vmem:[#allocation7 + $0x138] sm:$0xff]  ;;  %v609_v29 = vld [vmem:[#allocation7 + $0x130] sm:$0xff] }
 0x28b   :  { %1302 = vmatprep.subr.bf16.mxu1 %v1570_v0  ;;  %1288 = vmatprep.subr.bf16.mxu0 %v1287_v42  ;;  %v1291_v52 = vpack.c.bf16 %v410_v49, %v407_v48  ;;  %v1327_v42 = vpack.c.bf16 %v581_v31, %v578_v30  ;;  %v583_v48 = vld [vmem:[#allocation7 + $0x60] sm:$0xff]  ;;  %v612_v30 = vld [vmem:[#allocation7 + $0x148] sm:$0xff]  ;;  %v614_v31 = vld [vmem:[#allocation7 + $0x158] sm:$0xff] }
 0x28d   :  { %1290 = vmatpush1.bf16.msra.mxu0 %v1289_v46  ;;  %v587_v46 = vld [vmem:[#allocation7 + $0x80] sm:$0xff] }
 0x28e   :  { %1304 = vmatpush3.bf16.msra.mxu1 %v1303_v58  ;;  %v1293_v58 = vpack.c.bf16 %v409_v53, %v406_v50  ;;  %1292 = vmatprep.subr.bf16.mxu0 %v1291_v52  ;;  %v1331_v49 = vpack.c.bf16 %v587_v46, %v584_v45  ;;  %v586_v50 = vld [vmem:[#allocation7 + $0x78] sm:$0xff]  ;;  %v585_v52 = vld [vmem:[#allocation7 + $0x70] sm:$0xff]  ;;  %v588_v53 = vld [vmem:[#allocation7 + $0x88] sm:$0xff] }
 0x28f   :  { %1305 = vmatprep.subr.bf16.mxu1 %v1570_v0 }
 0x291   :  { %1294 = vmatpush1.bf16.msra.mxu0 %v1293_v58  ;;  %v589_v58 = vld [vmem:[#allocation7 + $0x90] sm:$0xff] }
 0x292   :  { %1307 = vmatpush3.bf16.msra.mxu1 %v1306_v11 }
 0x293   :  { %1308 = vmatprep.subr.bf16.mxu1 %v1570_v0 }
 0x296   :  { %1310 = vmatpush3.bf16.msra.mxu1 %v1309_v22  ;;  %v571_v22 = vld [vmem:[#allocation7] sm:$0xff] }
 0x297   :  { %1311 = vmatprep.subr.bf16.mxu1 %v1570_v0 }
 0x29a   :  { %1313 = vmatpush3.bf16.msra.mxu1 %v1312_v33  ;;  %v1325_v33 = vpack.c.bf16 %v574_v27, %v571_v22 }
 0x29b   :  { %1314 = vmatprep.subr.bf16.mxu1 %v1570_v0 }
 0x29e   :  { %1316 = vmatpush3.bf16.msra.mxu1 %v1315_v47 }
 0x29f   :  { %1317 = vmatprep.subr.bf16.mxu1 %v1570_v0 }
 0x2a2   :  { %1319 = vmatpush3.bf16.msra.mxu1 %v1318_v59  ;;  %v1335_v59 = vpack.c.bf16 %v593_v55, %v590_v54  ;;  %v1810_v54 = vld [vmem:[%s1864_s9 + $0x18] sm:$0xff] }
 0x2a3   :  { %1320 = vmatprep.subr.bf16.mxu1 %v1570_v0  ;;  %v421_v55 = vrot.slane %v1810_v54, %v1729_v38 }
 0x35c   :  { %v333_v61 = vpop.f32.mrb[0].mxu1 }
 0x35d   :  { %v334_v62 = vadd.f32 %v333_v61, %v266_v60  ;;  %v1113_v63 = vpop.f32.mrb[1].mxu1  ;;  %v1295_v60 = vpack.c.bf16 %v416_v57, %v413_v56  ;;  %v412_v61 = vld [vmem:[#allocation6 + $0x150] sm:$0xff]  ;;  %v1333_v56 = vpack.c.bf16 %v586_v50, %v583_v48  ;;  %v1362_v57 = vpack.c.bf16 %v588_v53, %v585_v52  ;;  %v817_v48 = vld [vmem:[#allocation9] sm:$0xff] }
 0x35e   :  { %v414_v63 = vld [vmem:[#allocation6 + $0x160] sm:$0xff] }
 0x35f   :  { %v1771_v1 = vmax.f32 %v334_v62, 0.0  ;;  %v415_v62 = vld [vmem:[#allocation6 + $0x168] sm:$0xff]  ;;  %1296 = vmatprep.subr.bf16.mxu0 %v1295_v60 }
 0x360   :  { %v1297_v5 = vpack.c.bf16 %v415_v62, %v412_v61  ;;  %v592_v60 = vld [vmem:[#allocation7 + $0xa8] sm:$0xff]  ;;  %v591_v61 = vld [vmem:[#allocation7 + $0xa0] sm:$0xff]  ;;  %v594_v62 = vld [vmem:[#allocation7 + $0xb8] sm:$0xff] }
 0x361   :  { %338 = vadd.xlane.f32.xlu0 %v1771_v1  ;;  %v340_v2 = vmul.f32 %v1771_v1, %v1771_v1  ;;  %v1337_v3 = vpack.c.bf16 %v592_v60, %v589_v58  ;;  %v1365_v4 = vpack.c.bf16 %v594_v62, %v591_v61 }
 0x362   :  { %1298 = vmatpush1.bf16.msra.mxu0 %v1297_v5  ;;  %v595_v5 = vld [vmem:[#allocation7 + $0xc0] sm:$0xff] }
 0x363   :  { %341 = vadd.xlane.f32.xlu1 %v340_v2  ;;  %v417_v2 = vld [vmem:[#allocation6 + $0x178] sm:$0xff]  ;;  %1324 = vmatprep.subr.bf16.mxu0 %v1323_v7 }
 0x364   :  { %v1321_v6 = vpack.c.bf16 %v417_v2, %v414_v63  ;;  %v596_v63 = vld [vmem:[#allocation7 + $0xc8] sm:$0xff]  ;;  %v599_v2 = vld [vmem:[#allocation7 + $0xe0] sm:$0xff]  ;;  %v598_v7 = vld [vmem:[#allocation7 + $0xd8] sm:$0xff] }
 0x366   :  { %1322 = vmatpush3.bf16.msra.mxu1 %v1321_v6  ;;  %v1339_v6 = vpack.c.bf16 %v599_v2, %v596_v63 }
 0x367   :  { %1355 = vmatprep.subr.bf16.mxu1 %v1570_v0 }
 0x377   :  { %366 = vperm.xlu0 %1422, %v363_v18  }
 0x3ee   :  { %v339_v8 = vpop.xlane.xlu0 %338 }
 0x3ef   :  { %v343_v9 = vmul.f32 0.03125, %v339_v8  ;;  %v597_v8 = vld [vmem:[#allocation7 + $0xd0] sm:$0xff] }
 0x3f0   :  { %v342_v10 = vpop.xlane.xlu1 %341 }
 0x3f1   :  { %v345_v11 = vmul.f32 %v343_v9, %v343_v9  ;;  %v344_v12 = vmul.f32 0.03125, %v342_v10  ;;  %v348_v18 = vsub.f32 %v1771_v1, %v343_v9  ;;  %v579_v1 = vld [vmem:[#allocation7 + $0x40] sm:$0xff]  ;;  %v600_v9 = vld [vmem:[#allocation7 + $0xe8] sm:$0xff]  ;;  %v602_v10 = vld [vmem:[#allocation7 + $0xf8] sm:$0xff] }
 0x3f2   :  { %v1359_v47 = vpack.c.bf16 %v582_v44, %v579_v1  ;;  %v618_v1 = vld [vmem:[#allocation7 + $0x178] sm:$0xff]  ;;  %v362_v44 = vld [vmem:[%s1856_s1] sm:$0xff] }
 0x3f3   :  { %v346_v13 = vsub.f32 %v344_v12, %v345_v11  ;;  %v605_v11 = vld [vmem:[#allocation7 + $0x110] sm:$0xff]  ;;  %v1341_v12 = vpack.c.bf16 %v598_v7, %v595_v5 }
 0x3f5   :  { %v347_v14 = vmax.f32 %v346_v13, 0.0  ;;  %v1368_v13 = vpack.c.bf16 %v600_v9, %v597_v8 }
 0x3f6   :  { %v367_v45 = vpop.permute.xlu0 %366 }
 0x3f7   :  { %v349_v15 = vadd.f32 1e-05, %v347_v14  ;;  %v601_v14 = vld [vmem:[#allocation7 + $0xf0] sm:$0xff] }
 0x3f8   :  { %v1345_v22 = vpack.c.bf16 %v604_v16, %v601_v14 }
 0x3f9   :  { %1427 = vrsqrt.f32 %v349_v15  ;;  %v1343_v15 = vpack.c.bf16 %v605_v11, %v602_v10  ;;  %v106_v10 = vld [vmem:[%s1864_s9 + $0x28] sm:$0xff] }
 0x3fa   :  { %v630_v11 = vrot.slane %v106_v10, %v1737_v40 }
 0x403   :  { %v1428_v21 = vpop.eup %1427 }
 0x404   :  { %v351_v23 = vmul.f32 %v1428_v21, %v348_v18  ;;  %v606_v18 = vld [vmem:[#allocation7 + $0x118] sm:$0xff]  ;;  %v611_v21 = vld [vmem:[#allocation7 + $0x140] sm:$0xff] }
 0x406   :  { %v356_v32 = vmul.f32 %v355_v19, %v351_v23  ;;  %v608_v19 = vld [vmem:[#allocation7 + $0x128] sm:$0xff]  ;;  %v1371_v23 = vpack.c.bf16 %v606_v18, %v603_v17 }
 0x407   :  { %v1347_v27 = vpack.c.bf16 %v611_v21, %v608_v19 }
 0x408   :  { %v361_v41 = vadd.f32 %v360_v24, %v356_v32  ;;  %v607_v24 = vld [vmem:[#allocation7 + $0x120] sm:$0xff]  ;;  %v617_v32 = vld [vmem:[#allocation7 + $0x170] sm:$0xff] }
 0x40a   :  { %495 = vmatmul.mubr.f32.vlgmr.msra.gmra.mrb[2].mxu0 %v361_v41  ;;  %1147 = vmatmul.mubr.f32.vlgmr.msra.gmra.mrb[2].mxu1 %v361_v41  ;;  %v1351_v41 = vpack.c.bf16 %v617_v32, %v614_v31  ;;  %v822_v31 = vld [vmem:[#allocation9 + $0x28] sm:$0xff] }
 0x40b   :  { %1326 = vmatpush1.bf16.msra.mxu0 %v1325_v33  ;;  %1357 = vmatpush3.bf16.msra.mxu1 %v1356_v34  ;;  %v1349_v33 = vpack.c.bf16 %v610_v28, %v607_v24  ;;  %v1374_v34 = vpack.c.bf16 %v612_v30, %v609_v29  ;;  %v820_v28 = vld [vmem:[#allocation9 + $0x18] sm:$0xff]  ;;  %v821_v30 = vld [vmem:[#allocation9 + $0x20] sm:$0xff] }
 0x40c   :  { %1328 = vmatprep.subr.bf16.mxu0 %v1327_v42  ;;  %1358 = vmatprep.subr.bf16.mxu1 %v1570_v0  ;;  %v616_v42 = vld [vmem:[#allocation7 + $0x168] sm:$0xff]  ;;  %v1386_v32 = vpack.c.bf16 %v822_v31, %v821_v30 }
 0x40d   :  { %695 = vmatprep.mubr.f32.mxu0 %v1572_v20  ;;  %1181 = vmatprep.mubr.msk.f32.mxu1 %vm1571_vm0, %v1572_v20  ;;  %v1353_v46 = vpack.c.bf16 %v616_v42, %v613_v36  ;;  %v826_v42 = vld [vmem:[#allocation9 + $0x48] sm:$0xff] }
 0x40f   :  { %1330 = vmatpush1.bf16.msra.mxu0 %v1329_v39  ;;  %1360 = vmatpush3.bf16.msra.mxu1 %v1359_v47  ;;  %v1377_v39 = vpack.c.bf16 %v618_v1, %v615_v43  ;;  %v369_v47 = vmul.f32 %v367_v45, %v362_v44  ;;  %v827_v1 = vld [vmem:[#allocation9 + $0x50] sm:$0xff]  ;;  %v828_v44 = vld [vmem:[#allocation9 + $0x58] sm:$0xff] }
 0x410   :  { %1332 = vmatprep.subr.bf16.mxu0 %v1331_v49  ;;  %1361 = vmatprep.subr.bf16.mxu1 %v1570_v0  ;;  %v818_v49 = vld [vmem:[#allocation9 + $0x8] sm:$0xff]  ;;  %v1395_v45 = vpack.c.bf16 %v828_v44, %v827_v1 }
 0x411   :  { %v1380_v50 = vpack.c.bf16 %v818_v49, %v817_v48  ;;  %v831_v48 = vld [vmem:[#allocation9 + $0x70] sm:$0xff]  ;;  %v832_v49 = vld [vmem:[#allocation9 + $0x78] sm:$0xff] }
 0x413   :  { %1334 = vmatpush1.bf16.msra.mxu0 %v1333_v56  ;;  %1363 = vmatpush3.bf16.msra.mxu1 %v1362_v57  ;;  %v622_v56 = vrot.slane %v1810_v54, %v1737_v40 }
 0x414   :  { %1336 = vmatprep.subr.bf16.mxu0 %v1335_v59  ;;  %1364 = vmatprep.subr.bf16.mxu1 %v1570_v0 }
 0x415   :  { %v1403_v59 = vadd.f32 %v622_v56, %v421_v55 }
 0x417   :  { %1338 = vmatpush1.bf16.msra.mxu0 %v1337_v3  ;;  %1366 = vmatpush3.bf16.msra.mxu1 %v1365_v4 }
 0x418   :  { %1340 = vmatprep.subr.bf16.mxu0 %v1339_v6  ;;  %1367 = vmatprep.subr.bf16.mxu1 %v1570_v0 }
 0x41b   :  { %1342 = vmatpush1.bf16.msra.mxu0 %v1341_v12  ;;  %1369 = vmatpush3.bf16.msra.mxu1 %v1368_v13  ;;  %v429_v12 = vrot.slane %v106_v10, %v1729_v38 }
 0x41c   :  { %1344 = vmatprep.subr.bf16.mxu0 %v1343_v15  ;;  %1370 = vmatprep.subr.bf16.mxu1 %v1570_v0 }
 0x41f   :  { %1346 = vmatpush1.bf16.msra.mxu0 %v1345_v22  ;;  %1372 = vmatpush3.bf16.msra.mxu1 %v1371_v23 }
 0x420   :  { %1348 = vmatprep.subr.bf16.mxu0 %v1347_v27  ;;  %1373 = vmatprep.subr.bf16.mxu1 %v1570_v0 }
 0x423   :  { %1350 = vmatpush1.bf16.msra.mxu0 %v1349_v33  ;;  %1375 = vmatpush3.bf16.msra.mxu1 %v1374_v34  ;;  %v823_v33 = vld [vmem:[#allocation9 + $0x30] sm:$0xff]  ;;  %v824_v34 = vld [vmem:[#allocation9 + $0x38] sm:$0xff] }
 0x424   :  { %1352 = vmatprep.subr.bf16.mxu0 %v1351_v41  ;;  %1376 = vmatprep.subr.bf16.mxu1 %v1570_v0  ;;  %v1389_v36 = vpack.c.bf16 %v824_v34, %v823_v33  ;;  %v825_v41 = vld [vmem:[#allocation9 + $0x40] sm:$0xff] }
 0x425   :  { %v1392_v43 = vpack.c.bf16 %v826_v42, %v825_v41 }
 0x427   :  { %1354 = vmatpush1.bf16.msra.mxu0 %v1353_v46  ;;  %1378 = vmatpush3.bf16.msra.mxu1 %v1377_v39  ;;  %v829_v46 = vld [vmem:[#allocation9 + $0x60] sm:$0xff]  ;;  %v830_v39 = vld [vmem:[#allocation9 + $0x68] sm:$0xff] }
 0x428   :  { %1379 = vmatprep.subr.bf16.mxu0 %v1570_v0 }
 0x42a   :  { %696 = vmatmul.mubr.f32.vlgmr.msra.gmra.mrb[2].mxu0 %v369_v47  ;;  %1182 = vmatmul.mubr.f32.vlgmr.msra.gmra.mrb[4].mxu1 %v369_v47 }
 0x42b   :  { %1216 = vmatprep.mubr.msk.f32.mxu0 %vm1571_vm0, %v1572_v20  ;;  %1381 = vmatpush3.bf16.msra.mxu0 %v1380_v50  ;;  %v105_v20 = vld [vmem:[%s1864_s9 + $0x20] sm:$0xff]  ;;  %v1401_v50 = vpack.c.bf16 %v832_v49, %v831_v48 }
 0x42c   :  { %1382 = vmatprep.subr.bf16.mxu0 %v1570_v0  ;;  %v425_v57 = vrot.slane %v105_v20, %v1729_v38  ;;  %v626_v58 = vrot.slane %v105_v20, %v1737_v40  ;;  %v819_v40 = vld [vmem:[#allocation9 + $0x10] sm:$0xff] }
 0x42d   :  { %v1383_v29 = vpack.c.bf16 %v820_v28, %v819_v40 }
 0x42e   :  { %v1405_v62 = vadd.f32 %v626_v58, %v425_v57 }
 0x42f   :  { %1384 = vmatpush3.bf16.msra.mxu0 %v1383_v29 }
 0x430   :  { %1385 = vmatprep.subr.bf16.mxu0 %v1570_v0 }
 0x433   :  { %1387 = vmatpush3.bf16.msra.mxu0 %v1386_v32 }
 0x434   :  { %1388 = vmatprep.subr.bf16.mxu0 %v1570_v0 }
 0x437   :  { %1390 = vmatpush3.bf16.msra.mxu0 %v1389_v36 }
 0x438   :  { %1391 = vmatprep.subr.bf16.mxu0 %v1570_v0 }
 0x43b   :  { %1393 = vmatpush3.bf16.msra.mxu0 %v1392_v43 }
 0x43c   :  { %1394 = vmatprep.subr.bf16.mxu0 %v1570_v0 }
 0x43f   :  { %1396 = vmatpush3.bf16.msra.mxu0 %v1395_v45 }
 0x440   :  { %1397 = vmatprep.subr.bf16.mxu0 %v1570_v0 }
 0x4dd   :  { %v567_v52 = vpop.f32.mrb[2].mxu1 }
 0x4de   :  { %v1148_v53 = vpop.f32.mrb[3].mxu1  ;;  %v568_v16 = vadd.f32 %v567_v52, %v429_v12 }
 0x4fd   :  { %v697_v60 = vpop.f32.mrb[2].mxu0  ;;  %v768_v61 = vpop.f32.mrb[4].mxu1 }
 0x4fe   :  { %v1404_v63 = vadd.f32 %v1403_v59, %v697_v60  ;;  %v699_v2 = vpop.f32.mrb[3].mxu0  ;;  %v1183_v3 = vpop.f32.mrb[5].mxu1  ;;  %v769_v14 = vadd.f32 %v768_v61, %v630_v11  ;;  %v810_v60 = vrot.slane %v1810_v54, %v150_v51 }
 0x4ff   :  { %v1406_v5 = vadd.f32 %v1405_v62, %v699_v2 }
 0x500   :  { %v957_v4 = vmul.f32 -1.442695, %v1404_v63 }
 0x501   :  { %v958_v6 = vmul.f32 -1.442695, %v1406_v5  ;;  %v907_v5 = vld [vmem:[%s1858_s3] sm:$0xff] }
 0x502   :  { %1429 = vpow2.f32 %v957_v4  ;;  %v836_v4 = vrot.slane %v1810_v54, %v244_v26  ;;  %vm908_vm1 = vcmp.eq.f32.partialorder %v907_v5, 0.0 }
 0x503   :  { %1431 = vpow2.f32 %v958_v6 }
 0x50c   :  { %v1430_v7 = vpop.eup %1429 }
 0x50d   :  { %v776_v8 = vadd.f32 1.0, %v1430_v7  ;;  %v1432_v9 = vpop.eup %1431 }
 0x50e   :  { %v783_v13 = vadd.f32 1.0, %v1432_v9  ;;  %v921_v9 = vand.u32 127, %v122_v35 }
 0x50f   :  { %1433 = vrcp.f32 %v776_v8 }
 0x510   :  { %1435 = vrcp.f32 %v783_v13  ;;  %vm942_vm5 = vcmp.eq.s32.totalorder %v921_v9, 126  ;;  %vm946_vm6 = vcmp.eq.s32.totalorder %v921_v9, 127 }
 0x519   :  { %v1434_v15 = vpop.eup %1433 }
 0x51a   :  { %v786_v17 = vmul.f32 %v1434_v15, %v769_v14  ;;  %v1436_v19 = vpop.eup %1435 }
 0x51b   :  { %v789_v21 = vsub.f32 1.0, %v1436_v19  ;;  %v791_v24 = vmul.f32 %v1436_v19, %v369_v47  ;;  %v1398_v47 = vpack.c.bf16 %v830_v39, %v829_v46 }
 0x51c   :  { %v787_v18 = vadd.f32 %v786_v17, %v568_v16 }
 0x51d   :  { %1399 = vmatpush3.bf16.msra.mxu0 %v1398_v47 }
 0x51e   :  { %1437 = vtanh.f32 %v787_v18  ;;  %1400 = vmatprep.subr.bf16.mxu0 %v1570_v0  ;;  %v815_v0 = vrot.slane %v1810_v54, %v239_v25 }
 0x521   :  { %1402 = vmatpush3.bf16.msra.mxu0 %v1401_v50 }
 0x528   :  { %v1438_v22 = vpop.eup %1437 }
 0x529   :  { %v790_v23 = vmul.f32 %v1438_v22, %v789_v21 }
 0x52b   :  { %v1826_v27 = vadd.f32 %v791_v24, %v790_v23 }
 0x52d   :  { %793 = vadd.xlane.f32.xlu1 %v1826_v27  ;;  %v795_v38 = vmul.f32 %v1826_v27, %v1826_v27 }
 0x531   :  { %796 = vadd.xlane.f32.xlu1 %v795_v38 }
 0x5ba   :  { %v794_v52 = vpop.xlane.xlu1 %793 }
 0x5bb   :  { %v798_v53 = vmul.f32 0.03125, %v794_v52 }
 0x5bd   :  { %v800_v56 = vmul.f32 %v798_v53, %v798_v53  ;;  %v803_v61 = vsub.f32 %v1826_v27, %v798_v53 }
 0x5be   :  { %v797_v55 = vpop.xlane.xlu1 %796 }
 0x5bf   :  { %v799_v20 = vmul.f32 0.03125, %v797_v55 }
 0x5c1   :  { %v801_v57 = vsub.f32 %v799_v20, %v800_v56 }
 0x5c3   :  { %v802_v58 = vmax.f32 %v801_v57, 0.0 }
 0x5c5   :  { %v804_v59 = vadd.f32 1e-05, %v802_v58 }
 0x5c7   :  { %1439 = vrsqrt.f32 %v804_v59 }
 0x5d1   :  { %v1440_v62 = vpop.eup %1439 }
 0x5d2   :  { %v806_v63 = vmul.f32 %v1440_v62, %v803_v61 }
 0x5d4   :  { %v811_v2 = vmul.f32 %v810_v60, %v806_v63 }
 0x5d6   :  { %v816_v3 = vadd.f32 %v815_v0, %v811_v2 }
 0x5d8   :  { %1217 = vmatmul.mubr.f32.vlgmr.msra.gmra.mrb[4].mxu0 %v816_v3 }
 0x6ab   :  { %v903_v51 = vpop.f32.mrb[4].mxu0 }
 0x6ac   :  { %v904_v6 = vadd.f32 %v903_v51, %v836_v4  ;;  %v1218_v7 = vpop.f32.mrb[5].mxu0 }
 0x6ae   :  { %v909_v8 = vsel %vm908_vm1, -1e+10, %v904_v6 }
 0x6af   :  { %910 = vmax.xlane.f32.xlu1 %v909_v8 }
 0x73c   :  { %v911_v25 = vpop.xlane.xlu1 %910 }
 0x73d   :  { %v912_v10 = vsub.f32 %v909_v8, %v911_v25  ;;  %vm922_vm2 = vcmp.eq.f32.partialorder %v909_v8, %v911_v25 }
 0x73e   :  { %v923_v11 = vsel %vm922_vm2, %v921_v9, 128 }
 0x73f   :  { %v913_v12 = vmul.f32 1.442695, %v912_v10  ;;  %v925_v37 = vshra.s32 %v923_v11, 16  ;;  %v924_v13 = vand.u32 65535, %v923_v11 }
 0x741   :  { %1441 = vpow2.f32 %v913_v12  ;;  %v927_v26 = vcvt.s32.f32 %v925_v37  ;;  %v926_v15 = vcvt.s32.f32 %v924_v13 }
 0x743   :  { %928 = vmin.xlane.f32.xlu1 %v927_v26 }
 0x74b   :  { %v1442_v54 = vpop.eup %1441 }
 0x74c   :  { %915 = vadd.xlane.f32.xlu1 %v1442_v54 }
 0x7d0   :  { %v929_v14 = vpop.xlane.xlu1 %928 }
 0x7d1   :  { %vm930_vm3 = vcmp.eq.f32.partialorder %v927_v26, %v929_v14  ;;  %v935_v18 = vcvt.f32.s32 %v929_v14 }
 0x7d2   :  { %v931_v16 = vsel %vm930_vm3, %v926_v15, inf }
 0x7d3   :  { %932 = vmin.xlane.f32.xlu1 %v931_v16  ;;  %v936_v22 = vshll.u32 %v935_v18, 16 }
 0x7d9   :  { %v916_v17 = vpop.xlane.xlu1 %915 }
 0x7da   :  { %1443 = vlog2.f32 %v916_v17 }
 0x7e4   :  { %v1444_v35 = vpop.eup %1443 }
 0x7e5   :  { %v918_v19 = vmul.f32 0.6931472, %v1444_v35 }
 0x7e7   :  { %v919_v38 = vsub.f32 %v912_v10, %v918_v19 }
 0x860   :  { %v933_v21 = vpop.xlane.xlu1 %932 }
 0x861   :  { %v934_v23 = vcvt.f32.s32 %v933_v21 }
 0x863   :  { %v937_v24 = vadd.s32 %v936_v22, %v934_v23 }
 0x865   :  { %vm938_vm4 = vcmp.eq.s32.totalorder %v921_v9, %v937_v24  ;;  %v943_v28 = vcvt.s32.f32 %v937_v24 }
 0x866   :  { %v939_v40 = vsel %vm938_vm4, %v919_v38, 0.0 }
 0x867   :  { %940 = vadd.xlane.f32.xlu1 %v939_v40  ;;  %v944_v29 = vsel %vm942_vm5, %v943_v28, 0.0 }
 0x868   :  { %v945_v30 = vadd.f32 %v944_v29, %v1826_v27 }
 0x8f4   :  { %v941_v31 = vpop.xlane.xlu1 %940 }
 0x8f5   :  { %v947_v32 = vsel %vm946_vm6, %v941_v31, 0.0 }
 0x8f6   :  { %v948_v33 = vadd.f32 %v947_v32, %v945_v30 }
 0x8f8   :  { %949 = vst [vmem:[%s1865_s10] sm:$0xff] %v948_v33 }
 0x8f9   :  { %954 = vsyncpa [#allocation3], 1 }
 0x8fa   :  { %955 = vsyncpa [#allocation5], 1 }
 0x8fb   :  { %956 = vsyncpa [#allocation8], 1 }

</bundles_post_ra>
